<compile_context>
chip_gen: v7x
topology: tpu7x:2x2x1
jax: 0.10.0
libtpu: 0.0.40
codegen_flags: <defaults>
</compile_context>

<pallas_src>
import functools

import jax
import jax.numpy as jnp
from jax.experimental import pallas as pl
from jax.experimental.pallas import tpu as pltpu


def _round_up(x, m):
  return (x + m - 1) // m * m


def _num_tensorcores_per_device():
  """Best-effort TensorCores per JAX device, used only for grid sizing."""
  try:
    kind = jax.devices()[0].device_kind.lower()
  except Exception:
    return 1
  # Single-TC generations (or one core per device): v2/v3, v5e, v6e/Trillium.
  single = ("v2", "v3", "v5e", "v5 lite", "v5lite", "v6e", "v6 lite",
            "v6lite", "trillium")
  if any(t in kind for t in single):
    return 1
  # v4 / v5p (megacore) and v7x expose two TensorCores per device.
  return 2


def _fused_kernel(s1_ref, s2_ref, a1_ref, a2_ref, w_ref, b_ref, hw3_ref,
                  hb3_ref, logp_ref, fphi1_ref, fphi2_ref, *,
                  l1, l2, compute_dtype):
  """attention bmm + g-MLP + token sum + h-MLP head + log-softmax, fused."""
  tb, l1p, hsz = s1_ref.shape
  _, l2p, _ = s2_ref.shape
  cdt = compute_dtype

  s1 = s1_ref[...]                       # (TB, L1p, H) f32
  s2 = s2_ref[...]                       # (TB, L2p, H)
  a1 = a1_ref[...]                       # (TB, L1p, L2p)
  a2 = a2_ref[...]                       # (TB, L2p, L1p)

  # Stacked weights [gW1a, gW1b, gW2, hW1a, hW1b, hW2] (6,H,H) in compute
  # dtype; stacked biases [gb1, gb2, hb1, hb2] (4,1,H) in f32.
  gW1a, gW1b, gW2 = w_ref[0], w_ref[1], w_ref[2]
  hW1a, hW1b, hW2 = w_ref[3], w_ref[4], w_ref[5]
  gb1, gb2, hb1, hb2 = b_ref[0], b_ref[1], b_ref[2], b_ref[3]
  hW3 = hw3_ref[...]
  hb3 = hb3_ref[...]

  # Per-example attention-weighted sums.  Tiny FLOPs; kept in f32 so attention
  # probabilities are not degraded on the bf16 compute path.
  attended2 = jnp.einsum("bij,bjh->bih", a1, s2,
                         preferred_element_type=jnp.float32)   # (TB, L1p, H)
  attended1 = jnp.einsum("bij,bjh->bih", a2, s1,
                         preferred_element_type=jnp.float32)   # (TB, L2p, H)

  # One g-MLP over BOTH sentences: stack rows along the sublane axis (TB and
  # L*p are multiples of 8, so the reshape + concat are layout-trivial).
  n1 = tb * l1p
  x_tok = jnp.concatenate(
      [s1.reshape(n1, hsz), s2.reshape(tb * l2p, hsz)], axis=0).astype(cdt)
  x_att = jnp.concatenate(
      [attended2.reshape(n1, hsz), attended1.reshape(tb * l2p, hsz)],
      axis=0).astype(cdt)

  # relu([x_tok | x_att] @ gW1 + gb1) in split-weight form (no lane concat),
  # f32 accumulation throughout.
  acc = jnp.dot(x_tok, gW1a, preferred_element_type=jnp.float32)
  acc = acc + jnp.dot(x_att, gW1b, preferred_element_type=jnp.float32)
  h1 = jnp.maximum(acc + gb1, 0.0)
  phi = jnp.maximum(
      jnp.dot(h1.astype(cdt), gW2, preferred_element_type=jnp.float32) + gb2,
      0.0)                                                     # (N1+N2, H) f32

  fphi1 = phi[:n1].reshape(tb, l1p, hsz).sum(axis=1)           # (TB, H)
  fphi2 = phi[n1:].reshape(tb, l2p, hsz).sum(axis=1)           # (TB, H)

  # Zero-padded token rows each contribute exactly g(0)=relu(relu(gb1)@gW2+gb2)
  # to the sum; subtract that constant (one tiny (1,H)@(H,H) dot) instead of a
  # (TB,Lp,H) iota+compare+select mask.  Static (trace-time) branch.
  if l1 != l1p or l2 != l2p:
    g0 = jnp.maximum(
        jnp.dot(jnp.maximum(gb1, 0.0).astype(cdt), gW2,
                preferred_element_type=jnp.float32) + gb2, 0.0)  # (1, H)
    if l1 != l1p:
      fphi1 = fphi1 - float(l1p - l1) * g0
    if l2 != l2p:
      fphi2 = fphi2 - float(l2p - l2) * g0

  # Classifier head (row-wise per example, so it fuses into the batch tile).
  # Split-weight form of relu([fphi1 | fphi2] @ hW1 + hb1).
  hacc = jnp.dot(fphi1.astype(cdt), hW1a, preferred_element_type=jnp.float32)
  hacc = hacc + jnp.dot(fphi2.astype(cdt), hW1b,
                        preferred_element_type=jnp.float32)
  hh1 = jnp.maximum(hacc + hb1, 0.0)
  hh2 = jnp.maximum(
      jnp.dot(hh1.astype(cdt), hW2, preferred_element_type=jnp.float32) + hb2,
      0.0)
  logits = (jnp.dot(hh2.astype(cdt), hW3,
                    preferred_element_type=jnp.float32) + hb3)  # (TB, labels)

  # LogSoftmax over labels.
  m = jnp.max(logits, axis=-1, keepdims=True)
  lse = jnp.log(jnp.sum(jnp.exp(logits - m), axis=-1, keepdims=True)) + m
  logp_ref[...] = logits - lse
  fphi1_ref[...] = fphi1
  fphi2_ref[...] = fphi2


def local_classifier_forward(sent1, sent2, att1, att2, params, *,
                             block_batch=None, compute_dtype=jnp.float32):
  """Returns (log_probs (B, num_labels), flat_phi1 (B, H), flat_phi2 (B, H))."""
  B, L1, H = sent1.shape
  _, L2, _ = sent2.shape
  num_labels = params["hW3"].shape[1]
  cdt = compute_dtype

  # Pad token dims to sublane multiples so the in-kernel flatten is free.
  L1p = _round_up(L1, 8)
  L2p = _round_up(L2, 8)

  # ---- batch-tile (TB) selection ------------------------------------------
  # Single-TC chips (v5e/v6e): grid=1 (per-step overhead buys nothing).
  # Dual-TC chips (v7x, v4/v5p): grid=2 so both cores get equal work.
  n_cores = _num_tensorcores_per_device()
  if block_batch is None:
    TB = _round_up(max(1, -(-B // n_cores)), 8)
  else:
    TB = _round_up(max(1, min(block_batch, B)), 8)

  # VMEM cap: keep the double-buffered per-step working set well under the
  # smallest scoped default (16 MiB on v5e) and far under v7x's 64 MiB
  # physical VMEM, so no vmem_limit override is needed on any generation.
  bytes_per_row = (L1p * H + L2p * H + 2 * L1p * L2p + 2 * H + num_labels) * 4
  weight_bytes = (6 * H * H + 4 * H + H * num_labels + num_labels) * 4
  budget = 12 * 1024 * 1024
  while TB > 8 and 2 * (TB * bytes_per_row + weight_bytes) > budget:
    TB = _round_up(TB // 2, 8)
  Bp = _round_up(B, TB)

  def pad_to(x, shape):
    pads = [(0, t - s) for s, t in zip(x.shape, shape)]
    return jnp.pad(x, pads) if any(p[1] for p in pads) else x

  # Activations stay in their HBM dtype (f32); any bf16 cast happens on-chip
  # inside the kernel right before the MXU dots (no wrapper astype pass).
  s1 = pad_to(sent1, (Bp, L1p, H))
  s2 = pad_to(sent2, (Bp, L2p, H))
  a1 = pad_to(att1, (Bp, L1p, L2p))
  a2 = pad_to(att2, (Bp, L2p, L1p))

  # Stack same-shape weights/biases -> 8 kernel inputs total (first-layer
  # weights are split top/bottom so the kernel never concats along lanes).
  gW1 = params["gW1"]
  hW1 = params["hW1"]
  w_stack = jnp.stack([gW1[:H], gW1[H:], params["gW2"],
                       hW1[:H], hW1[H:], params["hW2"]], axis=0).astype(cdt)
  b_stack = jnp.stack([params["gb1"], params["gb2"],
                       params["hb1"], params["hb2"]],
                      axis=0).astype(jnp.float32)               # (4, 1, H)
  hW3 = params["hW3"].astype(cdt)
  hb3 = params["hb3"].astype(jnp.float32)

  def batch_spec(*inner):
    zeros = (0,) * len(inner)
    return pl.BlockSpec((TB,) + inner, lambda b: (b,) + zeros)

  def full_spec(arr):
    zeros = (0,) * arr.ndim
    return pl.BlockSpec(arr.shape, lambda b: zeros)

  kernel = functools.partial(_fused_kernel, l1=L1, l2=L2, compute_dtype=cdt)

  logp_p, fphi1_p, fphi2_p = pl.pallas_call(
      kernel,
      out_shape=[jax.ShapeDtypeStruct((Bp, num_labels), jnp.float32),
                 jax.ShapeDtypeStruct((Bp, H), jnp.float32),
                 jax.ShapeDtypeStruct((Bp, H), jnp.float32)],
      grid_spec=pltpu.PrefetchScalarGridSpec(
          num_scalar_prefetch=0,
          grid=(Bp // TB,),
          in_specs=[batch_spec(L1p, H), batch_spec(L2p, H),
                    batch_spec(L1p, L2p), batch_spec(L2p, L1p),
                    full_spec(w_stack), full_spec(b_stack),
                    full_spec(hW3), full_spec(hb3)],
          out_specs=[pl.BlockSpec((TB, num_labels), lambda b: (b, 0)),
                     pl.BlockSpec((TB, H), lambda b: (b, 0)),
                     pl.BlockSpec((TB, H), lambda b: (b, 0))],
      ),
      compiler_params=pltpu.CompilerParams(
          dimension_semantics=("parallel",)),
  )(s1, s2, a1, a2, w_stack, b_stack, hW3, hb3)

  # Padded batch rows (Bp > B) carry bias-driven garbage; always slice.
  if Bp != B:
    return logp_p[:B], fphi1_p[:B], fphi2_p[:B]
  return logp_p, fphi1_p, fphi2_p


def make_params(key, hidden_size, num_labels):
  """Deterministic synthetic parameters; Linear weights stored (in, out)."""
  cat = 2 * hidden_size
  ks = jax.random.split(key, 10)

  def lin(kw, kb, fan_in, fan_out):
    bound = 1.0 / jnp.sqrt(fan_in)
    w = jax.random.uniform(kw, (fan_in, fan_out), jnp.float32, -bound, bound)
    b = jax.random.uniform(kb, (1, fan_out), jnp.float32, -bound, bound)
    return w, b

  gW1, gb1 = lin(ks[0], ks[1], cat, hidden_size)
  gW2, gb2 = lin(ks[2], ks[3], hidden_size, hidden_size)
  hW1, hb1 = lin(ks[4], ks[5], cat, hidden_size)
  hW2, hb2 = lin(ks[6], ks[7], hidden_size, hidden_size)
  hW3, hb3 = lin(ks[8], ks[9], hidden_size, num_labels)
  return dict(gW1=gW1, gb1=gb1, gW2=gW2, gb2=gb2,
              hW1=hW1, hb1=hb1, hW2=hW2, hb2=hb2, hW3=hW3, hb3=hb3)


def reference_forward(sent1, sent2, att1, att2, p):
  """Pure-JAX reference mirroring the PyTorch forward (eval mode)."""
  attended2 = jnp.einsum("bij,bjh->bih", att1, sent2)
  attended1 = jnp.einsum("bij,bjh->bih", att2, sent1)
  cat1 = jnp.concatenate([sent1, attended2], axis=-1)
  cat2 = jnp.concatenate([sent2, attended1], axis=-1)

  def g(x):
    x = jnp.maximum(x @ p["gW1"] + p["gb1"], 0.0)
    return jnp.maximum(x @ p["gW2"] + p["gb2"], 0.0)

  phi1 = g(cat1)
  phi2 = g(cat2)
  fp1 = phi1.sum(axis=1)
  fp2 = phi2.sum(axis=1)
  phi = jnp.concatenate([fp1, fp2], axis=-1)
  x = jnp.maximum(phi @ p["hW1"] + p["hb1"], 0.0)
  x = jnp.maximum(x @ p["hW2"] + p["hb2"], 0.0)
  logits = x @ p["hW3"] + p["hb3"]
  out = jax.nn.log_softmax(logits, axis=1)
  return out, fp1, fp2


if __name__ == "__main__":
  B, L1, L2, H, NUM_LABELS = 32, 8, 6, 32, 3

  key = jax.random.PRNGKey(0)
  k_s1, k_s2, k_a1, k_a2, k_p = jax.random.split(key, 5)

  sent1 = jax.random.normal(k_s1, (B, L1, H), jnp.float32)
  sent2 = jax.random.normal(k_s2, (B, L2, H), jnp.float32)
  # Attention weights (row-normalized, as produced upstream by a softmax).
  att1 = jax.nn.softmax(jax.random.normal(k_a1, (B, L1, L2), jnp.float32), -1)
  att2 = jax.nn.softmax(jax.random.normal(k_a2, (B, L2, L1), jnp.float32), -1)
  params = make_params(k_p, H, NUM_LABELS)

  # Primary run: f32, auto-tiled (grid=1 on single-TC chips, 2 on dual-TC).
  out, f1, f2 = local_classifier_forward(sent1, sent2, att1, att2, params)
  out, f1, f2 = jax.block_until_ready((out, f1, f2))

  ref_out, ref_f1, ref_f2 = reference_forward(sent1, sent2, att1, att2, params)
  assert jnp.allclose(out, ref_out, atol=1e-4, rtol=1e-4)
  assert jnp.allclose(f1, ref_f1, atol=1e-4, rtol=1e-4)
  assert jnp.allclose(f2, ref_f2, atol=1e-4, rtol=1e-4)

  # Exercise the padding paths (B not a multiple of TB; L1/L2 not multiples of
  # the 8-sublane tiling) and an explicit batch tile.
  B2, L1b, L2b = 10, 7, 6
  kk = jax.random.split(jax.random.PRNGKey(1), 4)
  s1b = jax.random.normal(kk[0], (B2, L1b, H), jnp.float32)
  s2b = jax.random.normal(kk[1], (B2, L2b, H), jnp.float32)
  a1b = jax.nn.softmax(jax.random.normal(kk[2], (B2, L1b, L2b), jnp.float32), -1)
  a2b = jax.nn.softmax(jax.random.normal(kk[3], (B2, L2b, L1b), jnp.float32), -1)
  ob, f1b, f2b = local_classifier_forward(s1b, s2b, a1b, a2b, params,
                                          block_batch=8)
  ob, f1b, f2b = jax.block_until_ready((ob, f1b, f2b))
  rob, rf1b, rf2b = reference_forward(s1b, s2b, a1b, a2b, params)
  assert jnp.allclose(ob, rob, atol=1e-4, rtol=1e-4)
  assert jnp.allclose(f1b, rf1b, atol=1e-4, rtol=1e-4)
  assert jnp.allclose(f2b, rf2b, atol=1e-4, rtol=1e-4)

  # bf16 MXU fast path (works on v5e/v6e/v7x): bf16 operands cast on-chip,
  # f32 attention bmm / accumulation / biases.
  out_bf, _, _ = local_classifier_forward(sent1, sent2, att1, att2, params,
                                          compute_dtype=jnp.bfloat16)
  out_bf = jax.block_until_ready(out_bf)
  assert bool(jnp.all(jnp.isfinite(out_bf)))
  assert float(jnp.max(jnp.abs(out_bf - ref_out))) < 0.25

  print("KERNEL_OK")
</pallas_src>

<mosaic_0001>
module attributes {stable_mosaic.version = 11 : i64} {
  func.func @_fused_kernel(%arg0: i32, %arg1: memref<16x8x32xf32, #tpu.memory_space<vmem>>, %arg2: memref<16x8x32xf32, #tpu.memory_space<vmem>>, %arg3: memref<16x8x8xf32, #tpu.memory_space<vmem>>, %arg4: memref<16x8x8xf32, #tpu.memory_space<vmem>>, %arg5: memref<6x32x32xf32, #tpu.memory_space<vmem>>, %arg6: memref<4x1x32xf32, #tpu.memory_space<vmem>>, %arg7: memref<32x3xf32, #tpu.memory_space<vmem>>, %arg8: memref<1x3xf32, #tpu.memory_space<vmem>>, %arg9: memref<16x3xf32, #tpu.memory_space<vmem>>, %arg10: memref<16x32xf32, #tpu.memory_space<vmem>>, %arg11: memref<16x32xf32, #tpu.memory_space<vmem>>) attributes {dimension_semantics = [#tpu.dimension_semantics<parallel>], iteration_bounds = array<i64: 2>, scalar_prefetch = 0 : i64, scratch_operands = 0 : i64, tpu.core_type = #tpu.core_type<tc>, window_params = [{transform_indices = @transform_0, window_bounds = array<i64: 16, 8, 32>}, {transform_indices = @transform_1, window_bounds = array<i64: 16, 8, 32>}, {transform_indices = @transform_2, window_bounds = array<i64: 16, 8, 8>}, {transform_indices = @transform_3, window_bounds = array<i64: 16, 8, 8>}, {pipeline_mode = #tpu.pipeline_mode<synchronous>, transform_indices = @transform_4, window_bounds = array<i64: 6, 32, 32>}, {pipeline_mode = #tpu.pipeline_mode<synchronous>, transform_indices = @transform_5, window_bounds = array<i64: 4, 1, 32>}, {pipeline_mode = #tpu.pipeline_mode<synchronous>, transform_indices = @transform_6, window_bounds = array<i64: 32, 3>}, {pipeline_mode = #tpu.pipeline_mode<synchronous>, transform_indices = @transform_7, window_bounds = array<i64: 1, 3>}, {transform_indices = @transform_8, window_bounds = array<i64: 16, 3>}, {transform_indices = @transform_9, window_bounds = array<i64: 16, 32>}, {transform_indices = @transform_10, window_bounds = array<i64: 16, 32>}]} {
    %c0 = arith.constant 0 : index
    %c0_0 = arith.constant 0 : index
    %c0_1 = arith.constant 0 : index
    %0 = vector.load %arg1[%c0, %c0_0, %c0_1] : memref<16x8x32xf32, #tpu.memory_space<vmem>>, vector<16x8x32xf32>
    %c0_2 = arith.constant 0 : index
    %c0_3 = arith.constant 0 : index
    %c0_4 = arith.constant 0 : index
    %1 = vector.load %arg2[%c0_2, %c0_3, %c0_4] : memref<16x8x32xf32, #tpu.memory_space<vmem>>, vector<16x8x32xf32>
    %c0_5 = arith.constant 0 : index
    %c0_6 = arith.constant 0 : index
    %c0_7 = arith.constant 0 : index
    %2 = vector.load %arg3[%c0_5, %c0_6, %c0_7] : memref<16x8x8xf32, #tpu.memory_space<vmem>>, vector<16x8x8xf32>
    %c0_8 = arith.constant 0 : index
    %c0_9 = arith.constant 0 : index
    %c0_10 = arith.constant 0 : index
    %3 = vector.load %arg4[%c0_8, %c0_9, %c0_10] : memref<16x8x8xf32, #tpu.memory_space<vmem>>, vector<16x8x8xf32>
    %c0_11 = arith.constant 0 : index
    %c0_12 = arith.constant 0 : index
    %c0_13 = arith.constant 0 : index
    %4 = vector.load %arg5[%c0_11, %c0_12, %c0_13] : memref<6x32x32xf32, #tpu.memory_space<vmem>>, vector<1x32x32xf32>
    %5 = vector.shape_cast %4 : vector<1x32x32xf32> to vector<32x32xf32>
    %c1 = arith.constant 1 : index
    %c0_14 = arith.constant 0 : index
    %c0_15 = arith.constant 0 : index
    %6 = vector.load %arg5[%c1, %c0_14, %c0_15] : memref<6x32x32xf32, #tpu.memory_space<vmem>>, vector<1x32x32xf32>
    %7 = vector.shape_cast %6 : vector<1x32x32xf32> to vector<32x32xf32>
    %c2 = arith.constant 2 : index
    %c0_16 = arith.constant 0 : index
    %c0_17 = arith.constant 0 : index
    %8 = vector.load %arg5[%c2, %c0_16, %c0_17] : memref<6x32x32xf32, #tpu.memory_space<vmem>>, vector<1x32x32xf32>
    %9 = vector.shape_cast %8 : vector<1x32x32xf32> to vector<32x32xf32>
    %c3 = arith.constant 3 : index
    %c0_18 = arith.constant 0 : index
    %c0_19 = arith.constant 0 : index
    %10 = vector.load %arg5[%c3, %c0_18, %c0_19] : memref<6x32x32xf32, #tpu.memory_space<vmem>>, vector<1x32x32xf32>
    %11 = vector.shape_cast %10 : vector<1x32x32xf32> to vector<32x32xf32>
    %c4 = arith.constant 4 : index
    %c0_20 = arith.constant 0 : index
    %c0_21 = arith.constant 0 : index
    %12 = vector.load %arg5[%c4, %c0_20, %c0_21] : memref<6x32x32xf32, #tpu.memory_space<vmem>>, vector<1x32x32xf32>
    %13 = vector.shape_cast %12 : vector<1x32x32xf32> to vector<32x32xf32>
    %c5 = arith.constant 5 : index
    %c0_22 = arith.constant 0 : index
    %c0_23 = arith.constant 0 : index
    %14 = vector.load %arg5[%c5, %c0_22, %c0_23] : memref<6x32x32xf32, #tpu.memory_space<vmem>>, vector<1x32x32xf32>
    %15 = vector.shape_cast %14 : vector<1x32x32xf32> to vector<32x32xf32>
    %c0_24 = arith.constant 0 : index
    %c0_25 = arith.constant 0 : index
    %c0_26 = arith.constant 0 : index
    %16 = vector.load %arg6[%c0_24, %c0_25, %c0_26] : memref<4x1x32xf32, #tpu.memory_space<vmem>>, vector<1x1x32xf32>
    %17 = vector.shape_cast %16 : vector<1x1x32xf32> to vector<1x32xf32>
    %c1_27 = arith.constant 1 : index
    %c0_28 = arith.constant 0 : index
    %c0_29 = arith.constant 0 : index
    %18 = vector.load %arg6[%c1_27, %c0_28, %c0_29] : memref<4x1x32xf32, #tpu.memory_space<vmem>>, vector<1x1x32xf32>
    %19 = vector.shape_cast %18 : vector<1x1x32xf32> to vector<1x32xf32>
    %c2_30 = arith.constant 2 : index
    %c0_31 = arith.constant 0 : index
    %c0_32 = arith.constant 0 : index
    %20 = vector.load %arg6[%c2_30, %c0_31, %c0_32] : memref<4x1x32xf32, #tpu.memory_space<vmem>>, vector<1x1x32xf32>
    %21 = vector.shape_cast %20 : vector<1x1x32xf32> to vector<1x32xf32>
    %c3_33 = arith.constant 3 : index
    %c0_34 = arith.constant 0 : index
    %c0_35 = arith.constant 0 : index
    %22 = vector.load %arg6[%c3_33, %c0_34, %c0_35] : memref<4x1x32xf32, #tpu.memory_space<vmem>>, vector<1x1x32xf32>
    %23 = vector.shape_cast %22 : vector<1x1x32xf32> to vector<1x32xf32>
    %c0_36 = arith.constant 0 : index
    %c0_37 = arith.constant 0 : index
    %24 = vector.load %arg7[%c0_36, %c0_37] : memref<32x3xf32, #tpu.memory_space<vmem>>, vector<32x3xf32>
    %c0_38 = arith.constant 0 : index
    %c0_39 = arith.constant 0 : index
    %25 = vector.load %arg8[%c0_38, %c0_39] : memref<1x3xf32, #tpu.memory_space<vmem>>, vector<1x3xf32>
    "tpu.trace_start"() <{level = 10 : i32, message = "bij,bjh->bih"}> : () -> ()
    %cst = arith.constant dense<0.000000e+00> : vector<16x8x32xf32>
    %26 = tpu.matmul %2, %1, %cst {dimension_numbers = #tpu.dot_dimension_numbers<[2], [1], [1], [2], [0, 0, 0, 1, 1, 2], [0], [0]>} : vector<16x8x8xf32>, vector<16x8x32xf32>, vector<16x8x32xf32> -> vector<16x8x32xf32>
    %cst_40 = arith.constant dense<0.000000e+00> : vector<16x8x32xf32>
    %27 = tpu.matmul %3, %0, %cst_40 {dimension_numbers = #tpu.dot_dimension_numbers<[2], [1], [1], [2], [0, 0, 0, 1, 1, 2], [0], [0]>} : vector<16x8x8xf32>, vector<16x8x32xf32>, vector<16x8x32xf32> -> vector<16x8x32xf32>
    "tpu.trace_stop"() : () -> ()
    %28 = vector.shape_cast %0 : vector<16x8x32xf32> to vector<128x32xf32>
    %29 = vector.shape_cast %1 : vector<16x8x32xf32> to vector<128x32xf32>
    %30 = tpu.concatenate %28, %29 in 0 : vector<128x32xf32>, vector<128x32xf32> -> vector<256x32xf32>
    %31 = vector.shape_cast %26 : vector<16x8x32xf32> to vector<128x32xf32>
    %32 = vector.shape_cast %27 : vector<16x8x32xf32> to vector<128x32xf32>
    %33 = tpu.concatenate %31, %32 in 0 : vector<128x32xf32>, vector<128x32xf32> -> vector<256x32xf32>
    %cst_41 = arith.constant dense<0.000000e+00> : vector<256x32xf32>
    %34 = tpu.matmul %30, %5, %cst_41 {dimension_numbers = #tpu.dot_dimension_numbers<[1], [0], [0], [1], [0, 0, 1, 1], [], []>} : vector<256x32xf32>, vector<32x32xf32>, vector<256x32xf32> -> vector<256x32xf32>
    %cst_42 = arith.constant dense<0.000000e+00> : vector<256x32xf32>
    %35 = tpu.matmul %33, %7, %cst_42 {dimension_numbers = #tpu.dot_dimension_numbers<[1], [0], [0], [1], [0, 0, 1, 1], [], []>} : vector<256x32xf32>, vector<32x32xf32>, vector<256x32xf32> -> vector<256x32xf32>
    %36 = arith.addf %34, %35 : vector<256x32xf32>
    %37 = vector.broadcast %17 : vector<1x32xf32> to vector<256x32xf32>
    %38 = arith.addf %36, %37 : vector<256x32xf32>
    %cst_43 = arith.constant 0.000000e+00 : f32
    %39 = vector.broadcast %cst_43 : f32 to vector<256x32xf32>
    %40 = arith.maximumf %38, %39 : vector<256x32xf32>
    %cst_44 = arith.constant dense<0.000000e+00> : vector<256x32xf32>
    %41 = tpu.matmul %40, %9, %cst_44 {dimension_numbers = #tpu.dot_dimension_numbers<[1], [0], [0], [1], [0, 0, 1, 1], [], []>} : vector<256x32xf32>, vector<32x32xf32>, vector<256x32xf32> -> vector<256x32xf32>
    %42 = vector.broadcast %19 : vector<1x32xf32> to vector<256x32xf32>
    %43 = arith.addf %41, %42 : vector<256x32xf32>
    %cst_45 = arith.constant 0.000000e+00 : f32
    %44 = vector.broadcast %cst_45 : f32 to vector<256x32xf32>
    %45 = arith.maximumf %43, %44 : vector<256x32xf32>
    %46 = vector.extract_strided_slice %45 {offsets = [0, 0], sizes = [128, 32], strides = [1, 1]} : vector<256x32xf32> to vector<128x32xf32>
    %47 = vector.shape_cast %46 : vector<128x32xf32> to vector<16x8x32xf32>
    %cst_46 = arith.constant dense<0.000000e+00> : vector<16x32xf32>
    %48 = vector.multi_reduction <add>, %47, %cst_46 [1] : vector<16x8x32xf32> to vector<16x32xf32>
    %49 = vector.extract_strided_slice %45 {offsets = [128, 0], sizes = [128, 32], strides = [1, 1]} : vector<256x32xf32> to vector<128x32xf32>
    %50 = vector.shape_cast %49 : vector<128x32xf32> to vector<16x8x32xf32>
    %cst_47 = arith.constant dense<0.000000e+00> : vector<16x32xf32>
    %51 = vector.multi_reduction <add>, %50, %cst_47 [1] : vector<16x8x32xf32> to vector<16x32xf32>
    %cst_48 = arith.constant 0.000000e+00 : f32
    %52 = vector.broadcast %cst_48 : f32 to vector<1x32xf32>
    %53 = arith.maximumf %17, %52 : vector<1x32xf32>
    %cst_49 = arith.constant dense<0.000000e+00> : vector<1x32xf32>
    %54 = tpu.matmul %53, %9, %cst_49 {dimension_numbers = #tpu.dot_dimension_numbers<[1], [0], [0], [1], [0, 0, 1, 1], [], []>} : vector<1x32xf32>, vector<32x32xf32>, vector<1x32xf32> -> vector<1x32xf32>
    %55 = arith.addf %54, %19 : vector<1x32xf32>
    %cst_50 = arith.constant 0.000000e+00 : f32
    %56 = vector.broadcast %cst_50 : f32 to vector<1x32xf32>
    %57 = arith.maximumf %55, %56 : vector<1x32xf32>
    %cst_51 = arith.constant 2.000000e+00 : f32
    %58 = vector.broadcast %cst_51 : f32 to vector<1x32xf32>
    %59 = arith.mulf %58, %57 : vector<1x32xf32>
    %60 = vector.broadcast %59 : vector<1x32xf32> to vector<16x32xf32>
    %61 = arith.subf %51, %60 : vector<16x32xf32>
    %cst_52 = arith.constant dense<0.000000e+00> : vector<16x32xf32>
    %62 = tpu.matmul %48, %11, %cst_52 {dimension_numbers = #tpu.dot_dimension_numbers<[1], [0], [0], [1], [0, 0, 1, 1], [], []>} : vector<16x32xf32>, vector<32x32xf32>, vector<16x32xf32> -> vector<16x32xf32>
    %cst_53 = arith.constant dense<0.000000e+00> : vector<16x32xf32>
    %63 = tpu.matmul %61, %13, %cst_53 {dimension_numbers = #tpu.dot_dimension_numbers<[1], [0], [0], [1], [0, 0, 1, 1], [], []>} : vector<16x32xf32>, vector<32x32xf32>, vector<16x32xf32> -> vector<16x32xf32>
    %64 = arith.addf %62, %63 : vector<16x32xf32>
    %65 = vector.broadcast %21 : vector<1x32xf32> to vector<16x32xf32>
    %66 = arith.addf %64, %65 : vector<16x32xf32>
    %cst_54 = arith.constant 0.000000e+00 : f32
    %67 = vector.broadcast %cst_54 : f32 to vector<16x32xf32>
    %68 = arith.maximumf %66, %67 : vector<16x32xf32>
    %cst_55 = arith.constant dense<0.000000e+00> : vector<16x32xf32>
    %69 = tpu.matmul %68, %15, %cst_55 {dimension_numbers = #tpu.dot_dimension_numbers<[1], [0], [0], [1], [0, 0, 1, 1], [], []>} : vector<16x32xf32>, vector<32x32xf32>, vector<16x32xf32> -> vector<16x32xf32>
    %70 = vector.broadcast %23 : vector<1x32xf32> to vector<16x32xf32>
    %71 = arith.addf %69, %70 : vector<16x32xf32>
    %cst_56 = arith.constant 0.000000e+00 : f32
    %72 = vector.broadcast %cst_56 : f32 to vector<16x32xf32>
    %73 = arith.maximumf %71, %72 : vector<16x32xf32>
    %cst_57 = arith.constant dense<0.000000e+00> : vector<16x3xf32>
    %74 = tpu.matmul %73, %24, %cst_57 {dimension_numbers = #tpu.dot_dimension_numbers<[1], [0], [0], [1], [0, 0, 1, 1], [], []>} : vector<16x32xf32>, vector<32x3xf32>, vector<16x3xf32> -> vector<16x3xf32>
    %75 = vector.broadcast %25 : vector<1x3xf32> to vector<16x3xf32>
    %76 = arith.addf %74, %75 : vector<16x3xf32>
    %cst_58 = arith.constant dense<0xFF800000> : vector<16xf32>
    %77 = vector.multi_reduction <maximumf>, %76, %cst_58 [1] : vector<16x3xf32> to vector<16xf32>
    %78 = vector.shape_cast %77 : vector<16xf32> to vector<16x1xf32>
    %79 = vector.broadcast %78 : vector<16x1xf32> to vector<16x3xf32>
    %80 = arith.subf %76, %79 : vector<16x3xf32>
    %81 = math.exp %80 : vector<16x3xf32>
    %cst_59 = arith.constant dense<0.000000e+00> : vector<16xf32>
    %82 = vector.multi_reduction <add>, %81, %cst_59 [1] : vector<16x3xf32> to vector<16xf32>
    %83 = vector.shape_cast %82 : vector<16xf32> to vector<16x1xf32>
    %84 = math.log %83 : vector<16x1xf32>
    %85 = arith.addf %84, %78 : vector<16x1xf32>
    %86 = vector.broadcast %85 : vector<16x1xf32> to vector<16x3xf32>
    %87 = arith.subf %76, %86 : vector<16x3xf32>
    %c0_60 = arith.constant 0 : index
    %c0_61 = arith.constant 0 : index
    %88 = vector.load %arg9[%c0_60, %c0_61] : memref<16x3xf32, #tpu.memory_space<vmem>>, vector<16x3xf32>
    tpu.vector_store %arg9[%c0_60, %c0_61], %87 {strides = array<i32>} : memref<16x3xf32, #tpu.memory_space<vmem>>, vector<16x3xf32>,
    %c0_62 = arith.constant 0 : index
    %c0_63 = arith.constant 0 : index
    %89 = vector.load %arg10[%c0_62, %c0_63] : memref<16x32xf32, #tpu.memory_space<vmem>>, vector<16x32xf32>
    tpu.vector_store %arg10[%c0_62, %c0_63], %48 {strides = array<i32>} : memref<16x32xf32, #tpu.memory_space<vmem>>, vector<16x32xf32>,
    %c0_64 = arith.constant 0 : index
    %c0_65 = arith.constant 0 : index
    %90 = vector.load %arg11[%c0_64, %c0_65] : memref<16x32xf32, #tpu.memory_space<vmem>>, vector<16x32xf32>
    tpu.vector_store %arg11[%c0_64, %c0_65], %61 {strides = array<i32>} : memref<16x32xf32, #tpu.memory_space<vmem>>, vector<16x32xf32>,
    return
  }
  func.func @transform_0(%arg0: i32) -> (i32, i32, i32) {
    %c0_i32 = arith.constant 0 : i32
    %c0_i32_0 = arith.constant 0 : i32
    %c0_i32_1 = arith.constant 0 : i32
    return %arg0, %c0_i32, %c0_i32_0 : i32, i32, i32
  }
  func.func @transform_1(%arg0: i32) -> (i32, i32, i32) {
    %c0_i32 = arith.constant 0 : i32
    %c0_i32_0 = arith.constant 0 : i32
    %c0_i32_1 = arith.constant 0 : i32
    return %arg0, %c0_i32, %c0_i32_0 : i32, i32, i32
  }
  func.func @transform_2(%arg0: i32) -> (i32, i32, i32) {
    %c0_i32 = arith.constant 0 : i32
    %c0_i32_0 = arith.constant 0 : i32
    %c0_i32_1 = arith.constant 0 : i32
    return %arg0, %c0_i32, %c0_i32_0 : i32, i32, i32
  }
  func.func @transform_3(%arg0: i32) -> (i32, i32, i32) {
    %c0_i32 = arith.constant 0 : i32
    %c0_i32_0 = arith.constant 0 : i32
    %c0_i32_1 = arith.constant 0 : i32
    return %arg0, %c0_i32, %c0_i32_0 : i32, i32, i32
  }
  func.func @transform_4(%arg0: i32) -> (i32, i32, i32) {
    %c0_i32 = arith.constant 0 : i32
    %c0_i32_0 = arith.constant 0 : i32
    %c0_i32_1 = arith.constant 0 : i32
    %c0_i32_2 = arith.constant 0 : i32
    return %c0_i32, %c0_i32_0, %c0_i32_1 : i32, i32, i32
  }
  func.func @transform_5(%arg0: i32) -> (i32, i32, i32) {
    %c0_i32 = arith.constant 0 : i32
    %c0_i32_0 = arith.constant 0 : i32
    %c0_i32_1 = arith.constant 0 : i32
    %c0_i32_2 = arith.constant 0 : i32
    return %c0_i32, %c0_i32_0, %c0_i32_1 : i32, i32, i32
  }
  func.func @transform_6(%arg0: i32) -> (i32, i32) {
    %c0_i32 = arith.constant 0 : i32
    %c0_i32_0 = arith.constant 0 : i32
    %c0_i32_1 = arith.constant 0 : i32
    return %c0_i32, %c0_i32_0 : i32, i32
  }
  func.func @transform_7(%arg0: i32) -> (i32, i32) {
    %c0_i32 = arith.constant 0 : i32
    %c0_i32_0 = arith.constant 0 : i32
    %c0_i32_1 = arith.constant 0 : i32
    return %c0_i32, %c0_i32_0 : i32, i32
  }
  func.func @transform_8(%arg0: i32) -> (i32, i32) {
    %c0_i32 = arith.constant 0 : i32
    %c0_i32_0 = arith.constant 0 : i32
    return %arg0, %c0_i32 : i32, i32
  }
  func.func @transform_9(%arg0: i32) -> (i32, i32) {
    %c0_i32 = arith.constant 0 : i32
    %c0_i32_0 = arith.constant 0 : i32
    return %arg0, %c0_i32 : i32, i32
  }
  func.func @transform_10(%arg0: i32) -> (i32, i32) {
    %c0_i32 = arith.constant 0 : i32
    %c0_i32_0 = arith.constant 0 : i32
    return %arg0, %c0_i32 : i32, i32
  }
}

</mosaic_0001>

<bundles_post_ra>
// kernel: tpu_custom_call.1
= control target key start
LH: loop header
LB: loop body
LE: loop exit
PB: predicated region body
PF: predicated region fallthrough
CT: control target
= control target key end

     0   :  { %s7051_s0 = inlined_call_operand.vmem [shape: f32[32,8,32], index: 0, kind: input, shape index: {}]   ;;  %s7052_s1 = inlined_call_operand.vmem [shape: f32[32,8,32], index: 1, kind: input, shape index: {}]   ;;  %s7053_s2 = inlined_call_operand.vmem [shape: f32[32,8,8], index: 2, kind: input, shape index: {}]   ;;  %s7054_s3 = inlined_call_operand.vmem [shape: f32[32,8,8], index: 3, kind: input, shape index: {}]   ;;  %s7055_s4 = inlined_call_operand.hbm [shape: f32[6,32,32], index: 4, kind: input, shape index: {}]   ;;  %s7056_s5 = inlined_call_operand.vmem [shape: f32[4,1,32], index: 5, kind: input, shape index: {}]   ;;  %s7057_s6 = inlined_call_operand.vmem [shape: f32[32,3], index: 6, kind: input, shape index: {}]   ;;  %s7058_s7 = inlined_call_operand.vmem [shape: f32[1,3], index: 7, kind: input, shape index: {}]   ;;  %s7059_s8 = inlined_call_operand.vmem [shape: f32[32,3], index: 8, kind: output, shape index: {0}]   ;;  %s7060_s9 = inlined_call_operand.hbm [shape: f32[32,32], index: 9, kind: output, shape index: {1}]   ;;  %s7061_s10 = inlined_call_operand.hbm [shape: f32[32,32], index: 10, kind: output, shape index: {2}]  }
   0x1   :  { %7066 = sst [smem:[#allocation11_spill]] %s7051_s0 }
   0x2   :  { %7067 = sst [smem:[#allocation12_spill]] %s7052_s1 }
   0x3   :  { %7068 = sst [smem:[#allocation13_spill]] %s7053_s2 }
   0x4   :  { %7069 = sst [smem:[#allocation14_spill]] %s7054_s3 }
   0x5   :  { %7070 = sst [smem:[#allocation15_spill]] %s7055_s4 }
   0x6   :  { %16 = vsyncpa [#allocation3], 0 }
   0x7   :  { %17 = vsyncpa [#allocation4], 0 }
   0x8   :  { %19 = vsyncpa [#allocation4 + $0x1], 0 }
   0x9   :  { %20 = vsyncpa [#allocation7], 0 }
   0xa   :  { %22 = vsyncpa [#allocation7 + $0x1], 0  ;;  %s6092_s13 = smov 0   ;;  %s6094_s14 = smov 0  }
   0xb   :  { %s6096_s15 = smov 0   ;;  %s6098_s16 = smov 0  }
   0xc LB: > { %s6113_s17 = sadd.s32 4294967295, %s6025_s16   ;;  %s4974_s18 = sadd.s32 4294967294, %s6025_s16   ;;  %s6025_s16 = sphi %s6098_s16, %s7090_s16   ;;  %s6021_s15 = sphi %s6096_s15, %s7089_s15   ;;  %s6017_s14 = sphi %s6094_s14, %s7088_s14   ;;  %s6013_s13 = sphi %s6092_s13, %s7087_s13  }
   0xd   : > { %s6117_s19 = sadd.s32 1, %s6025_s16   ;;  %s249_s20 = sadd.s32 1, %s6021_s15 }
   0xe   : > { %s246_s21 = ssub.s32 %s6025_s16, %s6117_s19  ;;  %p259_p0 = scmp.ne.s32.totalorder %s6021_s15, %s6017_s14 }
   0xf   : > { %p247_p1 = scmp.eq.s32.totalorder %s246_s21, 0  ;;  %p260_p2 = scmp.eq.s32.totalorder %s6113_s17, 1 }
  0x10   : > { %p265_p3 = scmp.ne.s32.totalorder %s6017_s14, %s6013_s13  ;;  %p266_p4 = scmp.eq.s32.totalorder %s4974_s18, 1 }
  0x11   : > { %s6128_s22 = scalar_select %p247_p1, %s6021_s15, %s249_s20  }
  0x12   : > { %p6130_p5 = por %p260_p2, %p259_p0  ;;  %p6134_p6 = por %p266_p4, %p265_p3 }
  0x13   : > { %p4975_p7 = scmp.ge.s32.totalorder %s6025_s16, 1  ;;  %p299_p8 = scmp.lt.s32.totalorder %s6025_s16, 3 }
  0x14   : > { %s7071_s23 = scalar_select %p6130_p5, 1, 0 }
  0x15   : > { %s7072_s24 = scalar_select %p6134_p6, 1, 0 }
  0x16   : > { %p7062_p9 = scmp.eq.s32.totalorder %s6113_s17, 0  ;;  %p6141_p10 = pnand %p4975_p7, %p299_p8 }
  0x17   : > { %s6027_s26 = smov [#allocation2]   ;;  %s7075_s4 = sld [smem:[#allocation15_spill]] }
  0x18   : > { %s7073_s25 = scalar_select %p6141_p10, 1, 0 }
  0x19   : > { %s311_s27 = sshll.u32 %s6027_s26, 4  ;;  %p5837_p11 = pneg %p6141_p10  ;;  %s312_s27 = int_to_ptr.vmem [resolvable:$true] %s311_s27 }
  0x1b   : > { %p6149_p12 = pnand %p7062_p9, %p5837_p11 }
  0x1d   : > { %s5899_s11 = scalar_lea.hbm %s7075_s4, 3072  ;;  %p5901_p0 = pneg %p6149_p12 }
  0x1e   : > { %p5900_p13 = scmp.ne.s32.totalorder %s7075_s4, %s5899_s11  ;;  %p5906_p3 = scmp.lt.u32.totalorder %s5899_s11, %s7075_s4 }
  0x20   : > { %p5902_p1 = pnand %p5901_p0, %p5900_p13 }
  0x22   : > { %p5903_p2 = pneg %p5902_p1 }
  0x24   : > { %p5908_p4 = pnand %p5906_p3, %p5903_p2 }
  0x26   : > { %5911 = shalt.err (!%p5908_p4)
}
  0x27   : > { %s5912_s26 = scalar_lea.vmem %s312_s27, 3072  ;;  %p5920_p9 = scmp.lt.s32.totalorder %s312_s27, %s312_s27 }
  0x28   : > { %p5913_p7 = scmp.ne.s32.totalorder %s312_s27, %s5912_s26  ;;  %p5921_p6 = scmp.lt.s32.totalorder %s5912_s26, %s5912_s26 }
  0x2a   : > { %p5915_p8 = pnand %p5913_p7, %p5901_p0  ;;  %p5922_p5 = por %p5921_p6, %p5920_p9 }
  0x2c   : > { %p5916_p11 = pneg %p5915_p8 }
  0x2e   : > { %p5923_p10 = pnand %p5922_p5, %p5916_p11 }
  0x30   : > { %5926 = shalt.err (!%p5923_p10)
}
  0x31   : > { %s6028_s29 = smov 128   ;;  %s6029_s30 = smov 8  }
  0x32   : > { %5840 = dma.hbm_to_vmem [thread:$0]  (!%p6149_p12), %s7075_s4, 3072, %s312_s27, [#allocation3], %s6028_s29, %s6028_s29, %s6029_s30  }
  0x33   : > { %p7076_p13 = scmp.ne.s32.totalorder %s7073_s25, 0 }
  0x34   : > { %p7077_p1 = scmp.eq.s32.totalorder (!%p7076_p13), %s6113_s17, 0 }
  0x35   : > { %372 = sbr.rel (%p7076_p13) target bundleno = 1843 (0x733), region = 52 }
  0x3c   : > { %6000 = dma.done.wait (%p7077_p1), [#allocation3], 3072   ;;  %p7078_p0 = pmov %p7077_p1 }
  0x3d   : > { %s4982_s11 = sshll.u32 %s6113_s17, 4  ;;  %v6030_v0 = vmov 0.0   ;;  %vm6031_vm0 = vmmov 0   ;;  %s7079_s1 = sld [smem:[#allocation12_spill]]  ;;  %vm572_vm1 = vcmask 64512   ;;  %v536_v60 = vld [vmem:[#allocation2 + $0x20] sm:$0xff] }
  0x3e   : > { %6002 = vsyncadd (%p7078_p0), [#allocation3], 4294964224  ;;  %5346 = vmatprep.subr.mxu0 %v6030_v0  ;;  %p436_p5 = scmp.lt.s32.totalorder %s4982_s11, 31  ;;  %5348 = vmatprep.mubr.msk.f32.mxu0 %vm6031_vm0, %v6030_v0  ;;  %s7080_s2 = sld [smem:[#allocation13_spill]]  ;;  %v537_v61 = vld [vmem:[#allocation2 + $0x28] sm:$0xff]  ;;  %vm2909_vm2 = vcmask 261120  }
  0x3f   : > { %5351 = vmatprep.subr.mxu1 %v6030_v0  ;;  %5353 = vmatprep.mubr.msk.f32.mxu1 %vm6031_vm0, %v6030_v0  ;;  %s7081_s0 = sld [smem:[#allocation11_spill]]  ;;  %s7082_s3 = sld [smem:[#allocation14_spill]]  ;;  %vm4318_vm3 = vcmask 1041409   ;;  %vm4321_vm4 = vcmask 1042434   ;;  %vm4324_vm5 = vcmask 1043459   ;;  %vm4327_vm6 = vcmask 1044484  }
  0x40   : > { %s7092_s11 = smov (!%p436_p5, %s4982_s11), 31  ;;  %vm4330_vm7 = vcmask 1045509   ;;  %vm4333_vm8 = vcmask 1046534   ;;  %vm4336_vm9 = vcmask 1047559   ;;  %vm4726_vm10 = vcmask 23552   ;;  %p7083_p9 = scmp.ne.s32.totalorder %s7071_s23, 0 }
  0x41   : > { %s6182_s25 = sshll.u32 %s7092_s11, 3  ;;  %s7065_s11 = sshll.u32 %s6113_s17, 8 }
  0x43   : > { %s6188_s20 = scalar_lea.vmem %s7079_s1, %s6182_s25 }
  0x44   : > { %s6194_s29 = scalar_lea.vmem %s7080_s2, %s6182_s25  ;;  %v6197_v1 = vld [vmem:[%s6188_s20] sm:$0xff]  ;;  %v6201_v3 = vld [vmem:[%s6188_s20 + $0x8] sm:$0xff]  ;;  %v6207_v5 = vld [vmem:[%s6188_s20 + $0x10] sm:$0xff] }
  0x45   : > { %v499_v2 = vld [vmem:[%s6194_s29] sm:$0xff]  ;;  %5347 = vmatpush3.msra.mxu0 %v6197_v1  ;;  %5352 = vmatpush3.msra.mxu1 %v6201_v3  ;;  %v500_v4 = vld [vmem:[%s6194_s29 + $0x8] sm:$0xff]  ;;  %v6212_v6 = vld [vmem:[%s6188_s20 + $0x18] sm:$0xff]  ;;  %s6321_s18 = scalar_lea.vmem %s7081_s0, %s6182_s25  ;;  %s6342_s28 = scalar_lea.vmem %s7082_s3, %s6182_s25 }
  0x46   : > { %5349 = vmatmul.mubr.msk.f32.vlgmr.msra.gmra.mrb[0].mxu0 %vm572_vm1, %v499_v2  ;;  %5356 = vmatprep.subr.mxu0 %v6030_v0  ;;  %v501_v7 = vld [vmem:[%s6194_s29 + $0x10] sm:$0xff]  ;;  %v502_v8 = vld [vmem:[%s6194_s29 + $0x18] sm:$0xff]  ;;  %v6222_v9 = vld [vmem:[%s6188_s20 + $0x20] sm:$0xff]  ;;  %s6961_s25 = scalar_lea.hbm %s7060_s9, %s7065_s11 }
  0x47   : > { %5354 = vmatmul.mubr.msk.f32.vlgmr.msra.gmra.mrb[0].mxu1 %vm572_vm1, %v500_v4  ;;  %5357 = vmatpush3.msra.mxu0 %v6207_v5  ;;  %v6230_v10 = vld [vmem:[%s6188_s20 + $0x28] sm:$0xff]  ;;  %v503_v11 = vld [vmem:[%s6194_s29 + $0x20] sm:$0xff]  ;;  %v6240_v13 = vld [vmem:[%s6188_s20 + $0x30] sm:$0xff] }
  0x48   : > { %5361 = vmatprep.subr.mxu1 %v6030_v0  ;;  %5358 = vmatprep.mubr.msk.f32.mxu0 %vm6031_vm0, %v6030_v0  ;;  %v504_v12 = vld [vmem:[%s6194_s29 + $0x28] sm:$0xff]  ;;  %v6248_v14 = vld [vmem:[%s6188_s20 + $0x38] sm:$0xff]  ;;  %v505_v15 = vld [vmem:[%s6194_s29 + $0x30] sm:$0xff] }
  0x49   : > { %5362 = vmatpush3.msra.mxu1 %v6212_v6  ;;  %5363 = vmatprep.mubr.msk.f32.mxu1 %vm6031_vm0, %v6030_v0  ;;  %v506_v16 = vld [vmem:[%s6194_s29 + $0x38] sm:$0xff]  ;;  %v6258_v17 = vld [vmem:[%s6188_s20 + $0x40] sm:$0xff]  ;;  %v6266_v18 = vld [vmem:[%s6188_s20 + $0x48] sm:$0xff] }
  0x4a   : > { %5359 = vmatmul.mubr.msk.f32.vlgmr.msra.gmra.mrb[2].mxu0 %vm572_vm1, %v501_v7  ;;  %5366 = vmatprep.subr.mxu0 %v6030_v0  ;;  %v507_v19 = vld [vmem:[%s6194_s29 + $0x40] sm:$0xff]  ;;  %v508_v20 = vld [vmem:[%s6194_s29 + $0x48] sm:$0xff]  ;;  %v6276_v21 = vld [vmem:[%s6188_s20 + $0x50] sm:$0xff] }
  0x4b   : > { %5364 = vmatmul.mubr.msk.f32.vlgmr.msra.gmra.mrb[2].mxu1 %vm572_vm1, %v502_v8  ;;  %5367 = vmatpush3.msra.mxu0 %v6222_v9  ;;  %v6284_v22 = vld [vmem:[%s6188_s20 + $0x58] sm:$0xff]  ;;  %v509_v23 = vld [vmem:[%s6194_s29 + $0x50] sm:$0xff]  ;;  %v6294_v25 = vld [vmem:[%s6188_s20 + $0x60] sm:$0xff]  ;;  %v5729_v8 = vpack.c.bf16 %v537_v61, %v536_v60 }
  0x4c   : > { %5371 = vmatprep.subr.mxu1 %v6030_v0  ;;  %5368 = vmatprep.mubr.msk.f32.mxu0 %vm6031_vm0, %v6030_v0  ;;  %v510_v24 = vld [vmem:[%s6194_s29 + $0x58] sm:$0xff]  ;;  %v6302_v26 = vld [vmem:[%s6188_s20 + $0x68] sm:$0xff]  ;;  %v511_v27 = vld [vmem:[%s6194_s29 + $0x60] sm:$0xff] }
  0x4d   : > { %5372 = vmatpush3.msra.mxu1 %v6230_v10  ;;  %5373 = vmatprep.mubr.msk.f32.mxu1 %vm6031_vm0, %v6030_v0  ;;  %v512_v28 = vld [vmem:[%s6194_s29 + $0x68] sm:$0xff]  ;;  %v6312_v29 = vld [vmem:[%s6188_s20 + $0x70] sm:$0xff]  ;;  %v6326_v30 = vld [vmem:[%s6188_s20 + $0x78] sm:$0xff] }
  0x4e   : > { %5369 = vmatmul.mubr.msk.f32.vlgmr.msra.gmra.mrb[4].mxu0 %vm572_vm1, %v503_v11  ;;  %5376 = vmatprep.subr.mxu0 %v6030_v0  ;;  %v513_v31 = vld [vmem:[%s6194_s29 + $0x70] sm:$0xff]  ;;  %v514_v32 = vld [vmem:[%s6194_s29 + $0x78] sm:$0xff]  ;;  %v6336_v33 = vld [vmem:[%s6321_s18] sm:$0xff]  ;;  %s6842_s29 = sand.u32 1, %s6017_s14  }
  0x4f   : > { %5374 = vmatmul.mubr.msk.f32.vlgmr.msra.gmra.mrb[4].mxu1 %vm572_vm1, %v504_v12  ;;  %5377 = vmatpush3.msra.mxu0 %v6240_v13  ;;  %v6350_v34 = vld [vmem:[%s6321_s18 + $0x8] sm:$0xff]  ;;  %v515_v35 = vld [vmem:[%s6342_s28] sm:$0xff]  ;;  %v6360_v37 = vld [vmem:[%s6321_s18 + $0x10] sm:$0xff]  ;;  %s4980_s30 = sshll.u32 %s6842_s29, 4 }
  0x50   : > { %5381 = vmatprep.subr.mxu1 %v6030_v0  ;;  %5378 = vmatprep.mubr.msk.f32.mxu0 %vm6031_vm0, %v6030_v0  ;;  %v516_v36 = vld [vmem:[%s6342_s28 + $0x8] sm:$0xff]  ;;  %v6368_v38 = vld [vmem:[%s6321_s18 + $0x18] sm:$0xff]  ;;  %v517_v39 = vld [vmem:[%s6342_s28 + $0x10] sm:$0xff]  ;;  %s6878_s12 = scalar_lea.vmem [#allocation6], %s4980_s30 }
  0x51   : > { %5382 = vmatpush3.msra.mxu1 %v6248_v14  ;;  %5383 = vmatprep.mubr.msk.f32.mxu1 %vm6031_vm0, %v6030_v0  ;;  %v518_v40 = vld [vmem:[%s6342_s28 + $0x18] sm:$0xff]  ;;  %v6378_v41 = vld [vmem:[%s6321_s18 + $0x20] sm:$0xff]  ;;  %v6386_v42 = vld [vmem:[%s6321_s18 + $0x28] sm:$0xff]  ;;  %s4807_s26 = sshll.u32 %s6878_s12, 4  ;;  %s6951_s26 = int_to_ptr.vmem [resolvable:$true] %s4807_s26 }
  0x52   : > { %5379 = vmatmul.mubr.msk.f32.vlgmr.msra.gmra.mrb[6].mxu0 %vm572_vm1, %v505_v15  ;;  %5386 = vmatprep.subr.mxu0 %v6030_v0  ;;  %v519_v43 = vld [vmem:[%s6342_s28 + $0x20] sm:$0xff]  ;;  %v520_v44 = vld [vmem:[%s6342_s28 + $0x28] sm:$0xff]  ;;  %v6396_v45 = vld [vmem:[%s6321_s18 + $0x30] sm:$0xff] }
  0x53   : > { %5384 = vmatmul.mubr.msk.f32.vlgmr.msra.gmra.mrb[6].mxu1 %vm572_vm1, %v506_v16  ;;  %5387 = vmatpush3.msra.mxu0 %v6258_v17  ;;  %v6404_v46 = vld [vmem:[%s6321_s18 + $0x38] sm:$0xff]  ;;  %v521_v47 = vld [vmem:[%s6342_s28 + $0x30] sm:$0xff]  ;;  %v6414_v49 = vld [vmem:[%s6321_s18 + $0x40] sm:$0xff] }
  0x54   : > { %5391 = vmatprep.subr.mxu1 %v6030_v0  ;;  %5388 = vmatprep.mubr.msk.f32.mxu0 %vm6031_vm0, %v6030_v0  ;;  %v522_v48 = vld [vmem:[%s6342_s28 + $0x38] sm:$0xff]  ;;  %v6422_v50 = vld [vmem:[%s6321_s18 + $0x48] sm:$0xff]  ;;  %v523_v51 = vld [vmem:[%s6342_s28 + $0x40] sm:$0xff] }
  0x55   : > { %5392 = vmatpush3.msra.mxu1 %v6266_v18  ;;  %5393 = vmatprep.mubr.msk.f32.mxu1 %vm6031_vm0, %v6030_v0  ;;  %v524_v52 = vld [vmem:[%s6342_s28 + $0x48] sm:$0xff]  ;;  %v6432_v53 = vld [vmem:[%s6321_s18 + $0x50] sm:$0xff]  ;;  %v6440_v54 = vld [vmem:[%s6321_s18 + $0x58] sm:$0xff] }
  0x56   : > { %5389 = vmatmul.mubr.msk.f32.vlgmr.msra.gmra.mrb[8].mxu0 %vm572_vm1, %v507_v19  ;;  %5396 = vmatprep.subr.mxu0 %v6030_v0  ;;  %v525_v55 = vld [vmem:[%s6342_s28 + $0x50] sm:$0xff]  ;;  %v526_v56 = vld [vmem:[%s6342_s28 + $0x58] sm:$0xff]  ;;  %v6450_v57 = vld [vmem:[%s6321_s18 + $0x60] sm:$0xff] }
  0x57   : > { %5394 = vmatmul.mubr.msk.f32.vlgmr.msra.gmra.mrb[8].mxu1 %vm572_vm1, %v508_v20  ;;  %5397 = vmatpush3.msra.mxu0 %v6276_v21  ;;  %v6458_v58 = vld [vmem:[%s6321_s18 + $0x68] sm:$0xff]  ;;  %v527_v59 = vld [vmem:[%s6342_s28 + $0x60] sm:$0xff]  ;;  %v6468_v63 = vld [vmem:[%s6321_s18 + $0x70] sm:$0xff] }
  0x58   : > { %5401 = vmatprep.subr.mxu1 %v6030_v0  ;;  %5398 = vmatprep.mubr.msk.f32.mxu0 %vm6031_vm0, %v6030_v0  ;;  %v528_v62 = vld [vmem:[%s6342_s28 + $0x68] sm:$0xff]  ;;  %v538_v2 = vld [vmem:[#allocation2 + $0x30] sm:$0xff]  ;;  %v539_v4 = vld [vmem:[#allocation2 + $0x38] sm:$0xff] }
  0x59   : > { %5402 = vmatpush3.msra.mxu1 %v6284_v22  ;;  %5403 = vmatprep.mubr.msk.f32.mxu1 %vm6031_vm0, %v6030_v0  ;;  %v6476_v7 = vld [vmem:[%s6321_s18 + $0x78] sm:$0xff]  ;;  %v529_v11 = vld [vmem:[%s6342_s28 + $0x70] sm:$0xff]  ;;  %v5733_v15 = vpack.c.bf16 %v539_v4, %v538_v2  ;;  %v531_v16 = vld [vmem:[#allocation2] sm:$0xff]  ;;  %s6885_s18 = scalar_lea.vmem [#allocation5], %s4980_s30 }
  0x5a   : > { %5399 = vmatmul.mubr.msk.f32.vlgmr.msra.gmra.mrb[10].mxu0 %vm572_vm1, %v509_v23  ;;  %5406 = vmatprep.subr.mxu0 %v6030_v0  ;;  %v530_v12 = vld [vmem:[%s6342_s28 + $0x78] sm:$0xff]  ;;  %v532_v19 = vld [vmem:[#allocation2 + $0x8] sm:$0xff]  ;;  %v541_v23 = vld [vmem:[#allocation2 + $0x40] sm:$0xff]  ;;  %s4791_s30 = sshll.u32 %s6885_s18, 4  ;;  %s6953_s30 = int_to_ptr.vmem [resolvable:$true] %s4791_s30 }
  0x5b   : > { %5404 = vmatmul.mubr.msk.f32.vlgmr.msra.gmra.mrb[10].mxu1 %vm572_vm1, %v510_v24  ;;  %5407 = vmatpush3.msra.mxu0 %v6294_v25  ;;  %v5737_v20 = vpack.c.bf16 %v532_v19, %v531_v16  ;;  %v542_v24 = vld [vmem:[#allocation2 + $0x48] sm:$0xff]  ;;  %s5927_s21 = scalar_lea.vmem %s6953_s30, 256 }
  0x5c   : > { %5411 = vmatprep.subr.mxu1 %v6030_v0  ;;  %5408 = vmatprep.mubr.msk.f32.mxu0 %vm6031_vm0, %v6030_v0  ;;  %p5928_p6 = scmp.ne.s32.totalorder %s6953_s30, %s5927_s21 }
  0x5d   : > { %5412 = vmatpush3.msra.mxu1 %v6302_v26  ;;  %5413 = vmatprep.mubr.msk.f32.mxu1 %vm6031_vm0, %v6030_v0 }
  0x5e   : > { %5409 = vmatmul.mubr.msk.f32.vlgmr.msra.gmra.mrb[12].mxu0 %vm572_vm1, %v511_v27  ;;  %5416 = vmatprep.subr.mxu0 %v6030_v0  ;;  %v6490_v27 = vpack.c.bf16 %v542_v24, %v541_v23  ;;  %p5929_p10 = pnand %p5928_p6, %p7083_p9 }
  0x5f   : > { %5414 = vmatmul.mubr.msk.f32.vlgmr.msra.gmra.mrb[12].mxu1 %vm572_vm1, %v512_v28  ;;  %5417 = vmatpush3.msra.mxu0 %v6312_v29  ;;  %v533_v28 = vld [vmem:[#allocation2 + $0x10] sm:$0xff] }
  0x60   : > { %5421 = vmatprep.subr.mxu1 %v6030_v0  ;;  %5418 = vmatprep.mubr.msk.f32.mxu0 %vm6031_vm0, %v6030_v0  ;;  %p5930_p12 = pneg %p5929_p10 }
  0x61   : > { %5422 = vmatpush3.msra.mxu1 %v6326_v30  ;;  %5423 = vmatprep.mubr.msk.f32.mxu1 %vm6031_vm0, %v6030_v0 }
  0x62   : > { %5419 = vmatmul.mubr.msk.f32.vlgmr.msra.gmra.mrb[14].mxu0 %vm572_vm1, %v513_v31  ;;  %5426 = vmatprep.subr.mxu0 %v6030_v0  ;;  %v534_v31 = vld [vmem:[#allocation2 + $0x18] sm:$0xff] }
  0x63   : > { %5424 = vmatmul.mubr.msk.f32.vlgmr.msra.gmra.mrb[14].mxu1 %vm572_vm1, %v514_v32  ;;  %5427 = vmatpush3.msra.mxu0 %v6336_v33 }
  0x64   : > { %5431 = vmatprep.subr.mxu1 %v6030_v0  ;;  %5428 = vmatprep.mubr.msk.f32.mxu0 %vm6031_vm0, %v6030_v0 }
  0x65   : > { %5432 = vmatpush3.msra.mxu1 %v6350_v34  ;;  %5433 = vmatprep.mubr.msk.f32.mxu1 %vm6031_vm0, %v6030_v0 }
  0x66   : > { %5429 = vmatmul.mubr.msk.f32.vlgmr.msra.gmra.mrb[16].mxu0 %vm572_vm1, %v515_v35  ;;  %5436 = vmatprep.subr.mxu0 %v6030_v0  ;;  %v5741_v35 = vpack.c.bf16 %v534_v31, %v533_v28 }
  0x67   : > { %5434 = vmatmul.mubr.msk.f32.vlgmr.msra.gmra.mrb[16].mxu1 %vm572_vm1, %v516_v36  ;;  %5437 = vmatpush3.msra.mxu0 %v6360_v37 }
  0x68   : > { %5441 = vmatprep.subr.mxu1 %v6030_v0  ;;  %5438 = vmatprep.mubr.msk.f32.mxu0 %vm6031_vm0, %v6030_v0 }
  0x69   : > { %5442 = vmatpush3.msra.mxu1 %v6368_v38  ;;  %5443 = vmatprep.mubr.msk.f32.mxu1 %vm6031_vm0, %v6030_v0 }
  0x6a   : > { %5439 = vmatmul.mubr.msk.f32.vlgmr.msra.gmra.mrb[18].mxu0 %vm572_vm1, %v517_v39  ;;  %5446 = vmatprep.subr.mxu0 %v6030_v0 }
  0x6b   : > { %5444 = vmatmul.mubr.msk.f32.vlgmr.msra.gmra.mrb[18].mxu1 %vm572_vm1, %v518_v40  ;;  %5447 = vmatpush3.msra.mxu0 %v6378_v41 }
  0x6c   : > { %5451 = vmatprep.subr.mxu1 %v6030_v0  ;;  %5448 = vmatprep.mubr.msk.f32.mxu0 %vm6031_vm0, %v6030_v0 }
  0x6d   : > { %5452 = vmatpush3.msra.mxu1 %v6386_v42  ;;  %5453 = vmatprep.mubr.msk.f32.mxu1 %vm6031_vm0, %v6030_v0 }
  0x6e   : > { %5449 = vmatmul.mubr.msk.f32.vlgmr.msra.gmra.mrb[20].mxu0 %vm572_vm1, %v519_v43  ;;  %5456 = vmatprep.subr.mxu0 %v6030_v0 }
  0x6f   : > { %5454 = vmatmul.mubr.msk.f32.vlgmr.msra.gmra.mrb[20].mxu1 %vm572_vm1, %v520_v44  ;;  %5457 = vmatpush3.msra.mxu0 %v6396_v45 }
  0x70   : > { %5461 = vmatprep.subr.mxu1 %v6030_v0  ;;  %5458 = vmatprep.mubr.msk.f32.mxu0 %vm6031_vm0, %v6030_v0 }
  0x71   : > { %5462 = vmatpush3.msra.mxu1 %v6404_v46  ;;  %5463 = vmatprep.mubr.msk.f32.mxu1 %vm6031_vm0, %v6030_v0 }
  0x72   : > { %5459 = vmatmul.mubr.msk.f32.vlgmr.msra.gmra.mrb[22].mxu0 %vm572_vm1, %v521_v47  ;;  %5466 = vmatprep.subr.mxu0 %v6030_v0 }
  0x73   : > { %5464 = vmatmul.mubr.msk.f32.vlgmr.msra.gmra.mrb[22].mxu1 %vm572_vm1, %v522_v48  ;;  %5467 = vmatpush3.msra.mxu0 %v6414_v49 }
  0x74   : > { %5471 = vmatprep.subr.mxu1 %v6030_v0  ;;  %5468 = vmatprep.mubr.msk.f32.mxu0 %vm6031_vm0, %v6030_v0 }
  0x75   : > { %5472 = vmatpush3.msra.mxu1 %v6422_v50  ;;  %5473 = vmatprep.mubr.msk.f32.mxu1 %vm6031_vm0, %v6030_v0 }
  0x76   : > { %5469 = vmatmul.mubr.msk.f32.vlgmr.msra.gmra.mrb[24].mxu0 %vm572_vm1, %v523_v51  ;;  %5476 = vmatprep.subr.mxu0 %v6030_v0 }
  0x77   : > { %5474 = vmatmul.mubr.msk.f32.vlgmr.msra.gmra.mrb[24].mxu1 %vm572_vm1, %v524_v52  ;;  %5477 = vmatpush3.msra.mxu0 %v6432_v53 }
  0x78   : > { %5481 = vmatprep.subr.mxu1 %v6030_v0  ;;  %5478 = vmatprep.mubr.msk.f32.mxu0 %vm6031_vm0, %v6030_v0 }
  0x79   : > { %5482 = vmatpush3.msra.mxu1 %v6440_v54  ;;  %5483 = vmatprep.mubr.msk.f32.mxu1 %vm6031_vm0, %v6030_v0 }
  0x7a   : > { %5479 = vmatmul.mubr.msk.f32.vlgmr.msra.gmra.mrb[26].mxu0 %vm572_vm1, %v525_v55  ;;  %5486 = vmatprep.subr.mxu0 %v6030_v0 }
  0x7b   : > { %5484 = vmatmul.mubr.msk.f32.vlgmr.msra.gmra.mrb[26].mxu1 %vm572_vm1, %v526_v56  ;;  %5487 = vmatpush3.msra.mxu0 %v6450_v57 }
  0x7c   : > { %5491 = vmatprep.subr.mxu1 %v6030_v0  ;;  %5488 = vmatprep.mubr.msk.f32.mxu0 %vm6031_vm0, %v6030_v0 }
  0x7d   : > { %5492 = vmatpush3.msra.mxu1 %v6458_v58  ;;  %5493 = vmatprep.mubr.msk.f32.mxu1 %vm6031_vm0, %v6030_v0 }
  0x7e   : > { %5489 = vmatmul.mubr.msk.f32.vlgmr.msra.gmra.mrb[28].mxu0 %vm572_vm1, %v527_v59  ;;  %5496 = vmatprep.subr.mxu0 %v6030_v0 }
  0x7f   : > { %5494 = vmatmul.mubr.msk.f32.vlgmr.msra.gmra.mrb[28].mxu1 %vm572_vm1, %v528_v62  ;;  %5497 = vmatpush3.msra.mxu0 %v6468_v63 }
  0x80   : > { %5501 = vmatprep.subr.mxu1 %v6030_v0  ;;  %5498 = vmatprep.mubr.msk.f32.mxu0 %vm6031_vm0, %v6030_v0 }
  0x81   : > { %5502 = vmatpush3.msra.mxu1 %v6476_v7  ;;  %5503 = vmatprep.mubr.msk.f32.mxu1 %vm6031_vm0, %v6030_v0 }
  0x82   : > { %5499 = vmatmul.mubr.msk.f32.vlgmr.msra.gmra.mrb[30].mxu0 %vm572_vm1, %v529_v11  ;;  %5730 = vmatprep.subr.bf16.mxu0 %v5729_v8 }
  0x83   : > { %5504 = vmatmul.mubr.msk.f32.vlgmr.msra.gmra.mrb[30].mxu1 %vm572_vm1, %v530_v12  ;;  %5732 = vmatpush3.bf16.msra.mxu0 %v5729_v8 }
  0x84   : > { %5734 = vmatprep.subr.bf16.mxu0 %v5733_v15  ;;  %5791 = vmatprep.subr.bf16.mxu1 %v5729_v8 }
  0x85   : > { %5793 = vmatpush3.bf16.msra.mxu1 %v5729_v8 }
  0x86   : > { %5792 = vmatprep.subr.bf16.mxu1 %v5733_v15 }
  0x87   : > { %5736 = vmatpush3.bf16.msra.mxu0 %v5733_v15 }
  0x88   : > { %5738 = vmatprep.subr.bf16.mxu0 %v5737_v20 }
  0x89   : > { %5794 = vmatpush3.bf16.msra.mxu1 %v5733_v15 }
  0x8a   : > { %5746 = vmatprep.subr.bf16.mxu1 %v6490_v27 }
 0x119   : > { %v642_v32 = vpop.f32.mrb[0].mxu0 }
 0x11a   : > { %v5350_v36 = vpop.f32.mrb[1].mxu0  ;;  %v715_v39 = vpop.f32.mrb[0].mxu1  ;;  %5514 = vmatprep.mubr.msk.f32.mxu0 %vm2909_vm2, %v642_v32 }
 0x11b   : > { %v5355_v40 = vpop.f32.mrb[1].mxu1  ;;  %5515 = vmatmul.mubr.msk.f32.vlgmr.msra.gmra.mrb[32].mxu0 %vm2909_vm2, %v715_v39 }
 0x11c   : > { %5740 = vmatpush3.bf16.msra.mxu0 %v5737_v20 }
 0x11d   : > { %v788_v43 = vpop.f32.mrb[2].mxu0  ;;  %5742 = vmatprep.subr.bf16.mxu0 %v5741_v35 }
 0x11e   : > { %v5360_v44 = vpop.f32.mrb[3].mxu0  ;;  %v861_v47 = vpop.f32.mrb[2].mxu1  ;;  %5517 = vmatprep.mubr.msk.f32.mxu0 %vm2909_vm2, %v788_v43 }
 0x11f   : > { %v5365_v48 = vpop.f32.mrb[3].mxu1  ;;  %5518 = vmatmul.mubr.msk.f32.gmra.mrb[34].mxu0 %vm2909_vm2, %v861_v47 }
 0x120   : > { %5744 = vmatpush3.bf16.msra.mxu0 %v5741_v35 }
 0x121   : > { %v934_v51 = vpop.f32.mrb[4].mxu0 }
 0x122   : > { %v5370_v52 = vpop.f32.mrb[5].mxu0  ;;  %v1007_v55 = vpop.f32.mrb[4].mxu1  ;;  %5520 = vmatprep.mubr.msk.f32.mxu0 %vm2909_vm2, %v934_v51 }
 0x123   : > { %v5375_v56 = vpop.f32.mrb[5].mxu1  ;;  %5521 = vmatmul.mubr.msk.f32.gmra.mrb[36].mxu0 %vm2909_vm2, %v1007_v55 }
 0x125   : > { %v1080_v59 = vpop.f32.mrb[6].mxu0 }
 0x126   : > { %v5380_v60 = vpop.f32.mrb[7].mxu0  ;;  %v1153_v61 = vpop.f32.mrb[6].mxu1  ;;  %5523 = vmatprep.mubr.msk.f32.mxu0 %vm2909_vm2, %v1080_v59 }
 0x127   : > { %v5385_v62 = vpop.f32.mrb[7].mxu1  ;;  %5524 = vmatmul.mubr.msk.f32.gmra.mrb[38].mxu0 %vm2909_vm2, %v1153_v61 }
 0x129   : > { %v1226_v2 = vpop.f32.mrb[8].mxu0 }
 0x12a   : > { %v5390_v4 = vpop.f32.mrb[9].mxu0  ;;  %v1299_v8 = vpop.f32.mrb[8].mxu1  ;;  %5526 = vmatprep.mubr.msk.f32.mxu0 %vm2909_vm2, %v1226_v2 }
 0x12b   : > { %v5395_v11 = vpop.f32.mrb[9].mxu1  ;;  %5527 = vmatmul.mubr.msk.f32.gmra.mrb[40].mxu0 %vm2909_vm2, %v1299_v8 }
 0x12d   : > { %v1372_v12 = vpop.f32.mrb[10].mxu0 }
 0x12e   : > { %v5400_v15 = vpop.f32.mrb[11].mxu0  ;;  %v1445_v16 = vpop.f32.mrb[10].mxu1  ;;  %5529 = vmatprep.mubr.msk.f32.mxu0 %vm2909_vm2, %v1372_v12 }
 0x12f   : > { %v5405_v19 = vpop.f32.mrb[11].mxu1  ;;  %5530 = vmatmul.mubr.msk.f32.gmra.mrb[42].mxu0 %vm2909_vm2, %v1445_v16 }
 0x131   : > { %v1518_v20 = vpop.f32.mrb[12].mxu0 }
 0x132   : > { %v5410_v23 = vpop.f32.mrb[13].mxu0  ;;  %v1591_v24 = vpop.f32.mrb[12].mxu1  ;;  %5532 = vmatprep.mubr.msk.f32.mxu0 %vm2909_vm2, %v1518_v20 }
 0x133   : > { %v5415_v28 = vpop.f32.mrb[13].mxu1  ;;  %5533 = vmatmul.mubr.msk.f32.gmra.mrb[44].mxu0 %vm2909_vm2, %v1591_v24 }
 0x135   : > { %v1664_v31 = vpop.f32.mrb[14].mxu0 }
 0x136   : > { %v5420_v32 = vpop.f32.mrb[15].mxu0  ;;  %v1737_v35 = vpop.f32.mrb[14].mxu1  ;;  %5535 = vmatprep.mubr.msk.f32.mxu0 %vm2909_vm2, %v1664_v31 }
 0x137   : > { %v5425_v36 = vpop.f32.mrb[15].mxu1  ;;  %5536 = vmatmul.mubr.msk.f32.gmra.mrb[46].mxu0 %vm2909_vm2, %v1737_v35 }
 0x139   : > { %v1810_v39 = vpop.f32.mrb[16].mxu0 }
 0x13a   : > { %v5430_v40 = vpop.f32.mrb[17].mxu0  ;;  %v1883_v43 = vpop.f32.mrb[16].mxu1  ;;  %5538 = vmatprep.mubr.msk.f32.mxu0 %vm2909_vm2, %v1810_v39 }
 0x13b   : > { %v5435_v44 = vpop.f32.mrb[17].mxu1  ;;  %5539 = vmatmul.mubr.msk.f32.gmra.mrb[48].mxu0 %vm2909_vm2, %v1883_v43 }
 0x13d   : > { %v1956_v47 = vpop.f32.mrb[18].mxu0 }
 0x13e   : > { %v5440_v48 = vpop.f32.mrb[19].mxu0  ;;  %v2029_v51 = vpop.f32.mrb[18].mxu1  ;;  %5541 = vmatprep.mubr.msk.f32.mxu0 %vm2909_vm2, %v1956_v47 }
 0x13f   : > { %v5445_v52 = vpop.f32.mrb[19].mxu1  ;;  %5542 = vmatmul.mubr.msk.f32.gmra.mrb[50].mxu0 %vm2909_vm2, %v2029_v51 }
 0x141   : > { %v2102_v55 = vpop.f32.mrb[20].mxu0 }
 0x142   : > { %v5450_v56 = vpop.f32.mrb[21].mxu0  ;;  %v2175_v59 = vpop.f32.mrb[20].mxu1  ;;  %5544 = vmatprep.mubr.msk.f32.mxu0 %vm2909_vm2, %v2102_v55 }
 0x143   : > { %v5455_v60 = vpop.f32.mrb[21].mxu1  ;;  %5545 = vmatmul.mubr.msk.f32.gmra.mrb[52].mxu0 %vm2909_vm2, %v2175_v59 }
 0x145   : > { %v2248_v61 = vpop.f32.mrb[22].mxu0 }
 0x146   : > { %v5460_v62 = vpop.f32.mrb[23].mxu0  ;;  %v2321_v2 = vpop.f32.mrb[22].mxu1  ;;  %5547 = vmatprep.mubr.msk.f32.mxu0 %vm2909_vm2, %v2248_v61 }
 0x147   : > { %v5465_v4 = vpop.f32.mrb[23].mxu1  ;;  %5548 = vmatmul.mubr.msk.f32.gmra.mrb[54].mxu0 %vm2909_vm2, %v2321_v2 }
 0x149   : > { %v2394_v8 = vpop.f32.mrb[24].mxu0 }
 0x14a   : > { %v5470_v11 = vpop.f32.mrb[25].mxu0  ;;  %v2467_v12 = vpop.f32.mrb[24].mxu1  ;;  %5550 = vmatprep.mubr.msk.f32.mxu0 %vm2909_vm2, %v2394_v8 }
 0x14b   : > { %v5475_v15 = vpop.f32.mrb[25].mxu1  ;;  %5551 = vmatmul.mubr.msk.f32.gmra.mrb[56].mxu0 %vm2909_vm2, %v2467_v12 }
 0x14c   : > { %5570 = vmatprep.mubr.msk.f32.mxu0 %vm2909_vm2, %v6336_v33 }
 0x14d   : > { %v2540_v16 = vpop.f32.mrb[26].mxu0 }
 0x14e   : > { %v5480_v19 = vpop.f32.mrb[27].mxu0  ;;  %v2613_v20 = vpop.f32.mrb[26].mxu1  ;;  %5553 = vmatprep.mubr.msk.f32.mxu1 %vm2909_vm2, %v2540_v16 }
 0x14f   : > { %5571 = vmatmul.mubr.msk.f32.vlgmr.msra.gmra.mrb[32].mxu0 %vm2909_vm2, %v6350_v34  ;;  %v5485_v23 = vpop.f32.mrb[27].mxu1  ;;  %5554 = vmatmul.mubr.msk.f32.vlgmr.msra.gmra.mrb[32].mxu1 %vm2909_vm2, %v2613_v20 }
 0x150   : > { %5573 = vmatprep.mubr.msk.f32.mxu0 %vm2909_vm2, %v6360_v37  ;;  %5748 = vmatpush3.bf16.msra.mxu1 %v6490_v27 }
 0x151   : > { %v2686_v24 = vpop.f32.mrb[28].mxu0 }
 0x152   : > { %v5490_v28 = vpop.f32.mrb[29].mxu0  ;;  %v2759_v31 = vpop.f32.mrb[28].mxu1  ;;  %5556 = vmatprep.mubr.msk.f32.mxu1 %vm2909_vm2, %v2686_v24 }
 0x153   : > { %5574 = vmatmul.mubr.msk.f32.gmra.mrb[34].mxu0 %vm2909_vm2, %v6368_v38  ;;  %v5495_v33 = vpop.f32.mrb[29].mxu1  ;;  %5557 = vmatmul.mubr.msk.f32.gmra.mrb[34].mxu1 %vm2909_vm2, %v2759_v31 }
 0x154   : > { %5576 = vmatprep.mubr.msk.f32.mxu0 %vm2909_vm2, %v6378_v41 }
 0x155   : > { %v2832_v34 = vpop.f32.mrb[30].mxu0 }
 0x156   : > { %v5500_v32 = vpop.f32.mrb[31].mxu0  ;;  %v2905_v35 = vpop.f32.mrb[30].mxu1  ;;  %5559 = vmatprep.mubr.msk.f32.mxu1 %vm2909_vm2, %v2832_v34 }
 0x157   : > { %5577 = vmatmul.mubr.msk.f32.gmra.mrb[36].mxu0 %vm2909_vm2, %v6386_v42  ;;  %v5505_v37 = vpop.f32.mrb[31].mxu1  ;;  %5560 = vmatmul.mubr.msk.f32.gmra.mrb[36].mxu1 %vm2909_vm2, %v2905_v35 }
 0x158   : > { %5579 = vmatprep.mubr.msk.f32.mxu0 %vm2909_vm2, %v6396_v45 }
 0x15b   : > { %5580 = vmatmul.mubr.msk.f32.gmra.mrb[38].mxu0 %vm2909_vm2, %v6404_v46 }
 0x15c   : > { %5582 = vmatprep.mubr.msk.f32.mxu0 %vm2909_vm2, %v6414_v49 }
 0x15f   : > { %5583 = vmatmul.mubr.msk.f32.gmra.mrb[40].mxu0 %vm2909_vm2, %v6422_v50 }
 0x160   : > { %5585 = vmatprep.mubr.msk.f32.mxu0 %vm2909_vm2, %v6432_v53 }
 0x163   : > { %5586 = vmatmul.mubr.msk.f32.gmra.mrb[42].mxu0 %vm2909_vm2, %v6440_v54 }
 0x164   : > { %5588 = vmatprep.mubr.msk.f32.mxu0 %vm2909_vm2, %v6450_v57 }
 0x167   : > { %5589 = vmatmul.mubr.msk.f32.gmra.mrb[44].mxu0 %vm2909_vm2, %v6458_v58 }
 0x168   : > { %5591 = vmatprep.mubr.msk.f32.mxu0 %vm2909_vm2, %v6468_v63 }
 0x16b   : > { %5592 = vmatmul.mubr.msk.f32.gmra.mrb[46].mxu0 %vm2909_vm2, %v6476_v7 }
 0x16c   : > { %5594 = vmatprep.mubr.msk.f32.mxu0 %vm2909_vm2, %v6197_v1  ;;  %v543_v1 = vld [vmem:[#allocation2 + $0x50] sm:$0xff] }
 0x16f   : > { %5595 = vmatmul.mubr.msk.f32.gmra.mrb[48].mxu0 %vm2909_vm2, %v6201_v3  ;;  %v544_v3 = vld [vmem:[#allocation2 + $0x58] sm:$0xff] }
 0x170   : > { %5597 = vmatprep.mubr.msk.f32.mxu0 %vm2909_vm2, %v6207_v5  ;;  %v5749_v5 = vpack.c.bf16 %v544_v3, %v543_v1 }
 0x172   : > { %5750 = vmatprep.subr.bf16.mxu1 %v5749_v5 }
 0x173   : > { %5598 = vmatmul.mubr.msk.f32.gmra.mrb[50].mxu0 %vm2909_vm2, %v6212_v6  ;;  %5752 = vmatpush3.bf16.msra.mxu1 %v5749_v5  ;;  %v6032_v6 = vmov 0.0|0.0  }
 0x174   : > { %5600 = vmatprep.mubr.msk.f32.mxu0 %vm2909_vm2, %v6222_v9  ;;  %5753 = vmatprep.subr.bf16.mxu1 %v6032_v6  ;;  %v3553_v9 = vlaneseq }
 0x177   : > { %5601 = vmatmul.mubr.msk.f32.gmra.mrb[52].mxu0 %vm2909_vm2, %v6230_v10  ;;  %v3554_v10 = vshrl.u32 %v3553_v9, 7 }
 0x178   : > { %5603 = vmatprep.mubr.msk.f32.mxu0 %vm2909_vm2, %v6240_v13 }
 0x179   : > { %v6590_v13 = vsub.s32 0, %v3554_v10 }
 0x17b   : > { %5604 = vmatmul.mubr.msk.f32.gmra.mrb[54].mxu0 %vm2909_vm2, %v6248_v14  ;;  %v6595_v14 = vld [vmem:[%s7056_s5] sm:$0x1] }
 0x17c   : > { %5606 = vmatprep.mubr.msk.f32.mxu0 %vm2909_vm2, %v6258_v17  ;;  %v6599_v17 = vrot.slane %v6595_v14, %v6590_v13 }
 0x17f   : > { %5607 = vmatmul.mubr.msk.f32.gmra.mrb[56].mxu0 %vm2909_vm2, %v6266_v18 }
 0x180   : > { %5609 = vmatprep.mubr.msk.f32.mxu0 %vm2909_vm2, %v6276_v21 }
 0x183   : > { %5610 = vmatmul.mubr.msk.f32.gmra.mrb[58].mxu0 %vm2909_vm2, %v6284_v22 }
 0x184   : > { %5612 = vmatprep.mubr.msk.f32.mxu0 %vm2909_vm2, %v6294_v25 }
 0x187   : > { %5613 = vmatmul.mubr.msk.f32.gmra.mrb[60].mxu0 %vm2909_vm2, %v6302_v26 }
 0x188   : > { %5615 = vmatprep.mubr.msk.f32.mxu0 %vm2909_vm2, %v6312_v29 }
 0x18b   : > { %5616 = vmatmul.mubr.msk.f32.gmra.mrb[62].mxu0 %vm2909_vm2, %v6326_v30 }
 0x222   : > { %v5572_v18 = vpop.f32.mrb[32].mxu0  ;;  %v6601_v21 = vpop.f32.mrb[32].mxu1 }
 0x223   : > { %v3559_v22 = vadd.f32 %v5572_v18, %v6599_v17  ;;  %v3393_v25 = vpop.f32.mrb[33].mxu0  ;;  %v6604_v26 = vpop.f32.mrb[33].mxu1 }
 0x224   : > { %v3558_v29 = vadd.f32 %v6599_v17, %v3393_v25 }
 0x225   : > { %v3591_v42 = vmax.f32 %v3559_v22, 0.0 }
 0x226   : > { %v3590_v30 = vmax.f32 %v3558_v29, 0.0  ;;  %v5575_v38 = vpop.f32.mrb[34].mxu0  ;;  %v6607_v41 = vpop.f32.mrb[34].mxu1 }
 0x227   : > { %v3561_v45 = vadd.f32 %v5575_v38, %v6599_v17  ;;  %v3403_v46 = vpop.f32.mrb[35].mxu0  ;;  %v6610_v49 = vpop.f32.mrb[35].mxu1 }
 0x228   : > { %v3560_v50 = vadd.f32 %v6599_v17, %v3403_v46  ;;  %5626 = vmatprep.mubr.msk.f32.mxu1 %vm2909_vm2, %v3590_v30 }
 0x229   : > { %5627 = vmatmul.mubr.msk.f32.vlgmr.msra.gmra.mrb[38].mxu1 %vm2909_vm2, %v3591_v42  ;;  %v3593_v58 = vmax.f32 %v3561_v45, 0.0 }
 0x22a   : > { %v3592_v53 = vmax.f32 %v3560_v50, 0.0  ;;  %v5578_v54 = vpop.f32.mrb[36].mxu0  ;;  %5755 = vmatpush3.bf16.msra.mxu1 %v6490_v27  ;;  %v6616_v57 = vpop.f32.mrb[36].mxu1 }
 0x22b   : > { %v3563_v63 = vadd.f32 %v5578_v54, %v6599_v17  ;;  %v3413_v7 = vpop.f32.mrb[37].mxu0  ;;  %5756 = vmatprep.subr.bf16.mxu1 %v6032_v6  ;;  %v6619_v36 = vpop.f32.mrb[37].mxu1 }
 0x22c   : > { %v3562_v39 = vadd.f32 %v6599_v17, %v3413_v7  ;;  %5629 = vmatprep.mubr.msk.f32.mxu1 %vm2909_vm2, %v3592_v53 }
 0x22d   : > { %5630 = vmatmul.mubr.msk.f32.gmra.mrb[40].mxu1 %vm2909_vm2, %v3593_v58  ;;  %v3595_v44 = vmax.f32 %v3563_v63, 0.0 }
 0x22e   : > { %v3594_v40 = vmax.f32 %v3562_v39, 0.0  ;;  %v5581_v43 = vpop.f32.mrb[38].mxu0  ;;  %5758 = vmatpush3.bf16.msra.mxu1 %v5749_v5 }
 0x22f   : > { %v3565_v27 = vadd.f32 %v5581_v43, %v6599_v17  ;;  %v3423_v47 = vpop.f32.mrb[39].mxu0 }
 0x230   : > { %v3564_v48 = vadd.f32 %v6599_v17, %v3423_v47  ;;  %5632 = vmatprep.mubr.msk.f32.mxu1 %vm2909_vm2, %v3594_v40 }
 0x231   : > { %5633 = vmatmul.mubr.msk.f32.gmra.mrb[42].mxu1 %vm2909_vm2, %v3595_v44  ;;  %v3597_v55 = vmax.f32 %v3565_v27, 0.0 }
 0x232   : > { %v3596_v51 = vmax.f32 %v3564_v48, 0.0  ;;  %v5584_v52 = vpop.f32.mrb[40].mxu0 }
 0x233   : > { %v3567_v56 = vadd.f32 %v5584_v52, %v6599_v17  ;;  %v3433_v59 = vpop.f32.mrb[41].mxu0 }
 0x234   : > { %v3566_v60 = vadd.f32 %v6599_v17, %v3433_v59  ;;  %5635 = vmatprep.mubr.msk.f32.mxu1 %vm2909_vm2, %v3596_v51 }
 0x235   : > { %5636 = vmatmul.mubr.msk.f32.gmra.mrb[44].mxu1 %vm2909_vm2, %v3597_v55  ;;  %v3599_v2 = vmax.f32 %v3567_v56, 0.0 }
 0x236   : > { %v3598_v61 = vmax.f32 %v3566_v60, 0.0  ;;  %v5587_v62 = vpop.f32.mrb[42].mxu0 }
 0x237   : > { %v3569_v4 = vadd.f32 %v5587_v62, %v6599_v17  ;;  %v3443_v8 = vpop.f32.mrb[43].mxu0 }
 0x238   : > { %v3568_v11 = vadd.f32 %v6599_v17, %v3443_v8  ;;  %5638 = vmatprep.mubr.msk.f32.mxu1 %vm2909_vm2, %v3598_v61 }
 0x239   : > { %5639 = vmatmul.mubr.msk.f32.gmra.mrb[46].mxu1 %vm2909_vm2, %v3599_v2  ;;  %v3601_v16 = vmax.f32 %v3569_v4, 0.0 }
 0x23a   : > { %v3600_v12 = vmax.f32 %v3568_v11, 0.0  ;;  %v5590_v15 = vpop.f32.mrb[44].mxu0 }
 0x23b   : > { %v3571_v19 = vadd.f32 %v5590_v15, %v6599_v17  ;;  %v3453_v20 = vpop.f32.mrb[45].mxu0 }
 0x23c   : > { %v3570_v23 = vadd.f32 %v6599_v17, %v3453_v20  ;;  %5641 = vmatprep.mubr.msk.f32.mxu1 %vm2909_vm2, %v3600_v12 }
 0x23d   : > { %5642 = vmatmul.mubr.msk.f32.gmra.mrb[48].mxu1 %vm2909_vm2, %v3601_v16  ;;  %v3603_v31 = vmax.f32 %v3571_v19, 0.0 }
 0x23e   : > { %v3602_v24 = vmax.f32 %v3570_v23, 0.0  ;;  %v5593_v28 = vpop.f32.mrb[46].mxu0 }
 0x23f   : > { %v3573_v33 = vadd.f32 %v5593_v28, %v6599_v17  ;;  %v3463_v34 = vpop.f32.mrb[47].mxu0 }
 0x240   : > { %v3572_v32 = vadd.f32 %v6599_v17, %v3463_v34  ;;  %5644 = vmatprep.mubr.msk.f32.mxu1 %vm2909_vm2, %v3602_v24  ;;  %v552_v34 = vld [vmem:[#allocation2 + $0x88] sm:$0xff] }
 0x241   : > { %5645 = vmatmul.mubr.msk.f32.gmra.mrb[50].mxu1 %vm2909_vm2, %v3603_v31  ;;  %v3605_v1 = vmax.f32 %v3573_v33, 0.0 }
 0x242   : > { %v3604_v35 = vmax.f32 %v3572_v32, 0.0  ;;  %v5596_v37 = vpop.f32.mrb[48].mxu0  ;;  %v553_v32 = vld [vmem:[#allocation2 + $0x90] sm:$0xff] }
 0x243   : > { %v3575_v3 = vadd.f32 %v5596_v37, %v6599_v17  ;;  %v3473_v5 = vpop.f32.mrb[49].mxu0 }
 0x244   : > { %v3574_v6 = vadd.f32 %v6599_v17, %v3473_v5  ;;  %5647 = vmatprep.mubr.msk.f32.mxu1 %vm2909_vm2, %v3604_v35  ;;  %v554_v35 = vld [vmem:[#allocation2 + $0x98] sm:$0xff] }
 0x245   : > { %5648 = vmatmul.mubr.msk.f32.gmra.mrb[52].mxu1 %vm2909_vm2, %v3605_v1  ;;  %v3607_v18 = vmax.f32 %v3575_v3, 0.0  ;;  %v5763_v37 = vpack.c.bf16 %v554_v35, %v553_v32  ;;  %v546_v1 = vld [vmem:[#allocation2 + $0x60] sm:$0xff]  ;;  %v547_v3 = vld [vmem:[#allocation2 + $0x68] sm:$0xff] }
 0x246   : > { %v3606_v9 = vmax.f32 %v3574_v6, 0.0  ;;  %v5599_v10 = vpop.f32.mrb[50].mxu0  ;;  %v6688_v5 = vpack.c.bf16 %v547_v3, %v546_v1 }
 0x247   : > { %v3577_v22 = vadd.f32 %v5599_v10, %v6599_v17  ;;  %v3483_v25 = vpop.f32.mrb[51].mxu0 }
 0x248   : > { %v3576_v29 = vadd.f32 %v6599_v17, %v3483_v25  ;;  %5650 = vmatprep.mubr.msk.f32.mxu1 %vm2909_vm2, %v3606_v9 }
 0x249   : > { %5651 = vmatmul.mubr.msk.f32.gmra.mrb[54].mxu1 %vm2909_vm2, %v3607_v18  ;;  %v3609_v42 = vmax.f32 %v3577_v22, 0.0 }
 0x24a   : > { %v3608_v30 = vmax.f32 %v3576_v29, 0.0  ;;  %v5602_v38 = vpop.f32.mrb[52].mxu0 }
 0x24b   : > { %v3579_v45 = vadd.f32 %v5602_v38, %v6599_v17  ;;  %v3493_v46 = vpop.f32.mrb[53].mxu0 }
 0x24c   : > { %v3578_v50 = vadd.f32 %v6599_v17, %v3493_v46  ;;  %5653 = vmatprep.mubr.msk.f32.mxu1 %vm2909_vm2, %v3608_v30 }
 0x24d   : > { %5654 = vmatmul.mubr.msk.f32.gmra.mrb[56].mxu1 %vm2909_vm2, %v3609_v42  ;;  %v3611_v58 = vmax.f32 %v3579_v45, 0.0 }
 0x24e   : > { %v3610_v53 = vmax.f32 %v3578_v50, 0.0  ;;  %v5605_v54 = vpop.f32.mrb[54].mxu0 }
 0x24f   : > { %v3581_v63 = vadd.f32 %v5605_v54, %v6599_v17  ;;  %v3503_v7 = vpop.f32.mrb[55].mxu0 }
 0x250   : > { %v3580_v39 = vadd.f32 %v6599_v17, %v3503_v7  ;;  %5656 = vmatprep.mubr.msk.f32.mxu1 %vm2909_vm2, %v3610_v53 }
 0x251   : > { %5657 = vmatmul.mubr.msk.f32.gmra.mrb[58].mxu1 %vm2909_vm2, %v3611_v58  ;;  %v3613_v44 = vmax.f32 %v3581_v63, 0.0 }
 0x252   : > { %v3612_v40 = vmax.f32 %v3580_v39, 0.0  ;;  %v5608_v43 = vpop.f32.mrb[56].mxu0 }
 0x253   : > { %v3583_v27 = vadd.f32 %v5608_v43, %v6599_v17  ;;  %v3513_v47 = vpop.f32.mrb[57].mxu0 }
 0x254   : > { %v3582_v48 = vadd.f32 %v6599_v17, %v3513_v47  ;;  %5659 = vmatprep.mubr.msk.f32.mxu1 %vm2909_vm2, %v3612_v40 }
 0x255   : > { %5660 = vmatmul.mubr.msk.f32.gmra.mrb[60].mxu1 %vm2909_vm2, %v3613_v44  ;;  %v3615_v55 = vmax.f32 %v3583_v27, 0.0 }
 0x256   : > { %v3614_v51 = vmax.f32 %v3582_v48, 0.0  ;;  %v5611_v52 = vpop.f32.mrb[58].mxu0 }
 0x257   : > { %v3529_v56 = vadd.f32 %v5611_v52, %v6601_v21  ;;  %v3523_v59 = vpop.f32.mrb[59].mxu0 }
 0x258   : > { %v3524_v60 = vadd.f32 %v3523_v59, %v6604_v26  ;;  %5662 = vmatprep.mubr.msk.f32.mxu1 %vm2909_vm2, %v3614_v51 }
 0x259   : > { %v3585_v61 = vadd.f32 %v6599_v17, %v3529_v56  ;;  %5663 = vmatmul.mubr.msk.f32.gmra.mrb[62].mxu1 %vm2909_vm2, %v3615_v55 }
 0x25a   : > { %v3584_v62 = vadd.f32 %v6599_v17, %v3524_v60  ;;  %v5614_v2 = vpop.f32.mrb[60].mxu0 }
 0x25b   : > { %v3539_v4 = vadd.f32 %v5614_v2, %v6607_v41  ;;  %v3533_v8 = vpop.f32.mrb[61].mxu0  ;;  %v3617_v15 = vmax.f32 %v3585_v61, 0.0 }
 0x25c   : > { %v3616_v11 = vmax.f32 %v3584_v62, 0.0  ;;  %v3534_v12 = vadd.f32 %v3533_v8, %v6610_v49 }
 0x25d   : > { %v3587_v21 = vadd.f32 %v6599_v17, %v3539_v4 }
 0x25e   : > { %v3586_v26 = vadd.f32 %v6599_v17, %v3534_v12  ;;  %v5617_v16 = vpop.f32.mrb[62].mxu0  ;;  %5665 = vmatprep.mubr.msk.f32.mxu1 %vm2909_vm2, %v3616_v11 }
 0x25f   : > { %v3549_v19 = vadd.f32 %v5617_v16, %v6616_v57  ;;  %v3543_v20 = vpop.f32.mrb[63].mxu0  ;;  %5666 = vmatmul.mubr.msk.f32.gmra.mrb[64].mxu1 %vm2909_vm2, %v3617_v15  ;;  %v3619_v24 = vmax.f32 %v3587_v21, 0.0  ;;  %v4205_v57 = vmax.f32 %v6595_v14, 0.0 }
 0x260   : > { %v3618_v23 = vmax.f32 %v3586_v26, 0.0  ;;  %v3544_v41 = vadd.f32 %v3543_v20, %v6619_v36  ;;  %v551_v36 = vld [vmem:[#allocation2 + $0x80] sm:$0xff] }
 0x261   : > { %v3589_v28 = vadd.f32 %v6599_v17, %v3549_v19 }
 0x262   : > { %v3588_v49 = vadd.f32 %v6599_v17, %v3544_v41  ;;  %5668 = vmatprep.mubr.msk.f32.mxu1 %vm2909_vm2, %v3618_v23  ;;  %v5759_v17 = vpack.c.bf16 %v552_v34, %v551_v36 }
 0x263   : > { %5669 = vmatmul.mubr.msk.f32.gmra.mrb[66].mxu1 %vm2909_vm2, %v3619_v24  ;;  %v3621_v33 = vmax.f32 %v3589_v28, 0.0 }
 0x264   : > { %v3620_v31 = vmax.f32 %v3588_v49, 0.0  ;;  %5760 = vmatprep.subr.bf16.mxu1 %v5759_v17 }
 0x266   : > { %5671 = vmatprep.mubr.msk.f32.mxu1 %vm2909_vm2, %v3620_v31 }
 0x267   : > { %5672 = vmatmul.mubr.msk.f32.gmra.mrb[68].mxu1 %vm2909_vm2, %v3621_v33 }
 0x268   : > { %5682 = vmatprep.mubr.msk.f32.mxu1 %vm6031_vm0, %v6030_v0  ;;  %v6694_v0 = vld [vmem:[%s7056_s5 + $0x1] sm:$0x1] }
 0x269   : > { %v6698_v14 = vrot.slane %v6694_v0, %v6590_v13 }
 0x26b   : > { %5683 = vmatmul.mubr.msk.f32.vlgmr.msra.gmra.mrb[70].mxu1 %vm2909_vm2, %v4205_v57 }
 0x26c   : > { %5762 = vmatpush3.bf16.msra.mxu1 %v5759_v17 }
 0x26d   : > { %5764 = vmatprep.subr.bf16.mxu1 %v5763_v37 }
 0x270   : > { %5766 = vmatpush3.bf16.msra.mxu1 %v5763_v37 }
 0x271   : > { %5768 = vmatprep.subr.bf16.mxu1 %v6688_v5 }
 0x2fc   : > { %v5628_v6 = vpop.f32.mrb[38].mxu1 }
 0x2fd   : > { %v3796_v9 = vadd.f32 %v5628_v6, %v6698_v14  ;;  %v3790_v10 = vpop.f32.mrb[39].mxu1 }
 0x2fe   : > { %v3791_v18 = vadd.f32 %v3790_v10, %v6698_v14 }
 0x2ff   : > { %v3950_v22 = vmax.f32 %v3796_v9, 0.0 }
 0x300   : > { %v3949_v25 = vmax.f32 %v3791_v18, 0.0  ;;  %v5631_v29 = vpop.f32.mrb[40].mxu1 }
 0x301   : > { %v3988_v30 = vsel %vm2909_vm2, %v3950_v22, 0.0  ;;  %v3806_v38 = vadd.f32 %v5631_v29, %v6698_v14  ;;  %v3800_v42 = vpop.f32.mrb[41].mxu1 }
 0x302   : > { %v3989_v45 = vrot.slane %v3988_v30, 4  ;;  %v3981_v46 = vsel %vm2909_vm2, %v3949_v25, 0.0  ;;  %v3801_v50 = vadd.f32 %v3800_v42, %v6698_v14 }
 0x303   : > { %v3982_v53 = vrot.slane %v3981_v46, 4  ;;  %v3952_v54 = vmax.f32 %v3806_v38, 0.0 }
 0x304   : > { %v3990_v58 = vadd.f32 %v3989_v45, %v3988_v30  ;;  %v3951_v63 = vmax.f32 %v3801_v50, 0.0  ;;  %v5634_v7 = vpop.f32.mrb[42].mxu1 }
 0x305   : > { %v3983_v39 = vadd.f32 %v3982_v53, %v3981_v46  ;;  %v4002_v40 = vsel %vm2909_vm2, %v3952_v54, 0.0  ;;  %v3816_v43 = vadd.f32 %v5634_v7, %v6698_v14  ;;  %v3810_v44 = vpop.f32.mrb[43].mxu1 }
 0x306   : > { %v3991_v27 = vrot.slane %v3990_v58, 2  ;;  %v4003_v47 = vrot.slane %v4002_v40, 4  ;;  %v3995_v48 = vsel %vm2909_vm2, %v3951_v63, 0.0  ;;  %v3811_v51 = vadd.f32 %v3810_v44, %v6698_v14 }
 0x307   : > { %v3984_v52 = vrot.slane %v3983_v39, 2  ;;  %v3996_v55 = vrot.slane %v3995_v48, 4  ;;  %v3954_v56 = vmax.f32 %v3816_v43, 0.0 }
 0x308   : > { %v3992_v59 = vadd.f32 %v3991_v27, %v3990_v58  ;;  %v4004_v60 = vadd.f32 %v4003_v47, %v4002_v40  ;;  %v3953_v61 = vmax.f32 %v3811_v51, 0.0  ;;  %v5637_v62 = vpop.f32.mrb[44].mxu1 }
 0x309   : > { %v3985_v2 = vadd.f32 %v3984_v52, %v3983_v39  ;;  %v3997_v4 = vadd.f32 %v3996_v55, %v3995_v48  ;;  %v4016_v8 = vsel %vm2909_vm2, %v3954_v56, 0.0  ;;  %v3826_v11 = vadd.f32 %v5637_v62, %v6698_v14  ;;  %v3820_v12 = vpop.f32.mrb[45].mxu1 }
 0x30a   : > { %v3993_v15 = vrot.slane %v3992_v59, 1  ;;  %v4005_v21 = vrot.slane %v4004_v60, 2  ;;  %v4017_v26 = vrot.slane %v4016_v8, 4  ;;  %v4009_v16 = vsel %vm2909_vm2, %v3953_v61, 0.0 }
 0x30b   : > { %v3986_v19 = vrot.slane %v3985_v2, 1  ;;  %v3998_v20 = vrot.slane %v3997_v4, 2  ;;  %v4010_v23 = vrot.slane %v4009_v16, 4  ;;  %v3956_v41 = vmax.f32 %v3826_v11, 0.0 }
 0x30c   : > { %v3994_v24 = vadd.f32 %v3993_v15, %v3992_v59  ;;  %v4006_v28 = vadd.f32 %v4005_v21, %v4004_v60  ;;  %v4018_v49 = vadd.f32 %v4017_v26, %v4016_v8  ;;  %v3821_v31 = vadd.f32 %v3820_v12, %v6698_v14  ;;  %v5640_v33 = vpop.f32.mrb[46].mxu1 }
 0x30d   : > { %v3987_v57 = vadd.f32 %v3986_v19, %v3985_v2  ;;  %v3999_v36 = vadd.f32 %v3998_v20, %v3997_v4  ;;  %v4011_v34 = vadd.f32 %v4010_v23, %v4009_v16  ;;  %v4030_v17 = vsel %vm2909_vm2, %v3956_v41, 0.0  ;;  %v3830_v32 = vpop.f32.mrb[47].mxu1 }
 0x30e   : > { %v4019_v35 = vrot.slane %v4018_v49, 2  ;;  %v4031_v37 = vrot.slane %v4030_v17, 4  ;;  %v3955_v1 = vmax.f32 %v3821_v31, 0.0  ;;  %v3836_v10 = vadd.f32 %v5640_v33, %v6698_v14 }
 0x30f   : > { %v4447_v3 = vsel %vm4318_vm3, %v3994_v24, %v3987_v57  ;;  %v4000_v6 = vrot.slane %v3999_v36, 1  ;;  %v4012_v9 = vrot.slane %v4011_v34, 2  ;;  %v4007_v18 = vrot.slane %v4006_v28, 1 }
 0x310   : > { %v4020_v22 = vadd.f32 %v4019_v35, %v4018_v49  ;;  %v4032_v25 = vadd.f32 %v4031_v37, %v4030_v17  ;;  %v4023_v29 = vsel %vm2909_vm2, %v3955_v1, 0.0  ;;  %v5643_v30 = vpop.f32.mrb[48].mxu1  ;;  %v3958_v46 = vmax.f32 %v3836_v10, 0.0 }
 0x311   : > { %v4001_v38 = vadd.f32 %v4000_v6, %v3999_v36  ;;  %v4013_v42 = vadd.f32 %v4012_v9, %v4011_v34  ;;  %v4024_v45 = vrot.slane %v4023_v29, 4  ;;  %v3840_v50 = vpop.f32.mrb[49].mxu1  ;;  %v3831_v58 = vadd.f32 %v3830_v32, %v6698_v14 }
 0x312   : > { %v4021_v53 = vrot.slane %v4020_v22, 1  ;;  %v4033_v54 = vrot.slane %v4032_v25, 2  ;;  %v3846_v63 = vadd.f32 %v5643_v30, %v6698_v14  ;;  %v4044_v40 = vsel %vm2909_vm2, %v3958_v46, 0.0 }
 0x313   : > { %v6721_v7 = vsel %vm4321_vm4, %v4001_v38, %v4447_v3  ;;  %v4025_v39 = vadd.f32 %v4024_v45, %v4023_v29  ;;  %v6724_v43 = vadd.f32 %v4007_v18, %v4006_v28  ;;  %v4045_v44 = vrot.slane %v4044_v40, 4 }
 0x314   : > { %v3957_v27 = vmax.f32 %v3831_v58, 0.0  ;;  %v5646_v47 = vpop.f32.mrb[50].mxu1  ;;  %v6726_v48 = vadd.f32 %v4021_v53, %v4020_v22  ;;  %v4014_v51 = vrot.slane %v4013_v42, 1  ;;  %v3960_v52 = vmax.f32 %v3846_v63, 0.0 }
 0x315   : > { %v3841_v55 = vadd.f32 %v3840_v50, %v6698_v14  ;;  %v3850_v56 = vpop.f32.mrb[51].mxu1  ;;  %v6729_v59 = vadd.f32 %v4033_v54, %v4032_v25  ;;  %v4046_v60 = vadd.f32 %v4045_v44, %v4044_v40  ;;  %v3856_v62 = vadd.f32 %v5646_v47, %v6698_v14 }
 0x316   : > { %v4037_v61 = vsel %vm2909_vm2, %v3957_v27, 0.0  ;;  %v4026_v2 = vrot.slane %v4025_v39, 2  ;;  %v4058_v8 = vsel %vm2909_vm2, %v3960_v52, 0.0  ;;  %v3851_v26 = vadd.f32 %v3850_v56, %v6698_v14 }
 0x317   : > { %v4038_v4 = vrot.slane %v4037_v61, 4  ;;  %v3959_v11 = vmax.f32 %v3841_v55, 0.0  ;;  %v4047_v12 = vrot.slane %v4046_v60, 2  ;;  %v4059_v15 = vrot.slane %v4058_v8, 4 }
 0x318   : > { %v3962_v21 = vmax.f32 %v3856_v62, 0.0  ;;  %v5649_v16 = vpop.f32.mrb[52].mxu1  ;;  %v6735_v19 = vadd.f32 %v4014_v51, %v4013_v42  ;;  %v4027_v57 = vadd.f32 %v4026_v2, %v4025_v39  ;;  %v3961_v17 = vmax.f32 %v3851_v26, 0.0 }
 0x319   : > { %v4039_v20 = vadd.f32 %v4038_v4, %v4037_v61  ;;  %v4051_v23 = vsel %vm2909_vm2, %v3959_v11, 0.0  ;;  %v3866_v41 = vadd.f32 %v5649_v16, %v6698_v14  ;;  %v3860_v24 = vpop.f32.mrb[53].mxu1  ;;  %v4048_v28 = vadd.f32 %v4047_v12, %v4046_v60 }
 0x31a   : > { %v4060_v49 = vadd.f32 %v4059_v15, %v4058_v8  ;;  %v4052_v31 = vrot.slane %v4051_v23, 4  ;;  %v4072_v33 = vsel %vm2909_vm2, %v3962_v21, 0.0  ;;  %v4065_v10 = vsel %vm2909_vm2, %v3961_v17, 0.0 }
 0x31b   : > { %v4040_v36 = vrot.slane %v4039_v20, 2  ;;  %v4073_v34 = vrot.slane %v4072_v33, 4  ;;  %v4049_v32 = vrot.slane %v4048_v28, 1  ;;  %v3964_v1 = vmax.f32 %v3866_v41, 0.0 }
 0x31c   : > { %v4061_v35 = vrot.slane %v4060_v49, 2  ;;  %v4053_v37 = vadd.f32 %v4052_v31, %v4051_v23  ;;  %v5652_v3 = vpop.f32.mrb[54].mxu1  ;;  %v3861_v18 = vadd.f32 %v3860_v24, %v6698_v14  ;;  %v4066_v38 = vrot.slane %v4065_v10, 4 }
 0x31d   : > { %v4041_v6 = vadd.f32 %v4040_v36, %v4039_v20  ;;  %v4074_v9 = vadd.f32 %v4073_v34, %v4072_v33  ;;  %v3870_v22 = vpop.f32.mrb[55].mxu1  ;;  %v4050_v25 = vadd.f32 %v4049_v32, %v4048_v28  ;;  %v4086_v46 = vsel %vm2909_vm2, %v3964_v1, 0.0 }
 0x31e   : > { %v4062_v29 = vadd.f32 %v4061_v35, %v4060_v49  ;;  %v4054_v30 = vrot.slane %v4053_v37, 2  ;;  %v3963_v50 = vmax.f32 %v3861_v18, 0.0  ;;  %v4035_v53 = vrot.slane %v6729_v59, 1 }
 0x31f   : > { %v4042_v42 = vrot.slane %v4041_v6, 1  ;;  %v4075_v45 = vrot.slane %v4074_v9, 2  ;;  %v4067_v58 = vadd.f32 %v4066_v38, %v4065_v10  ;;  %v4087_v63 = vrot.slane %v4086_v46, 4 }
 0x320   : > { %v4055_v54 = vadd.f32 %v4054_v30, %v4053_v37  ;;  %v5655_v39 = vpop.f32.mrb[56].mxu1  ;;  %v4079_v27 = vsel %vm2909_vm2, %v3963_v50, 0.0  ;;  %v3876_v47 = vadd.f32 %v5652_v3, %v6698_v14  ;;  %v4028_v52 = vrot.slane %v4027_v57, 1 }
 0x321   : > { %v4043_v40 = vadd.f32 %v4042_v42, %v4041_v6  ;;  %v4076_v44 = vadd.f32 %v4075_v45, %v4074_v9  ;;  %v3880_v51 = vpop.f32.mrb[57].mxu1  ;;  %v4068_v56 = vrot.slane %v4067_v58, 2  ;;  %v4088_v60 = vadd.f32 %v4087_v63, %v4086_v46 }
 0x322   : > { %v4056_v55 = vrot.slane %v4055_v54, 1  ;;  %v4063_v62 = vrot.slane %v4062_v29, 1  ;;  %v4080_v2 = vrot.slane %v4079_v27, 4  ;;  %v3966_v4 = vmax.f32 %v3876_v47, 0.0 }
 0x323   : > { %v4454_v61 = vsel %vm4318_vm3, %v4050_v25, %v4043_v40  ;;  %v4077_v11 = vrot.slane %v4076_v44, 1  ;;  %v4069_v12 = vadd.f32 %v4068_v56, %v4067_v58  ;;  %v3871_v15 = vadd.f32 %v3870_v22, %v6698_v14 }
 0x324   : > { %v4057_v8 = vadd.f32 %v4056_v55, %v4055_v54  ;;  %v5658_v21 = vpop.f32.mrb[58].mxu1  ;;  %v4089_v26 = vrot.slane %v4088_v60, 2  ;;  %v4081_v16 = vadd.f32 %v4080_v2, %v4079_v27  ;;  %v4100_v20 = vsel %vm2909_vm2, %v3966_v4, 0.0 }
 0x325   : > { %v3886_v23 = vadd.f32 %v5655_v39, %v6698_v14  ;;  %v3890_v41 = vpop.f32.mrb[59].mxu1  ;;  %v6750_v24 = vadd.f32 %v4028_v52, %v4027_v57  ;;  %v4070_v49 = vrot.slane %v4069_v12, 1  ;;  %v4101_v31 = vrot.slane %v4100_v20, 4 }
 0x326   : > { %v6753_v28 = vsel %vm4321_vm4, %v4057_v8, %v4454_v61  ;;  %v4082_v33 = vrot.slane %v4081_v16, 2  ;;  %v3965_v36 = vmax.f32 %v3871_v15, 0.0  ;;  %v3881_v17 = vadd.f32 %v3880_v51, %v6698_v14 }
 0x327   : > { %v3968_v34 = vmax.f32 %v3886_v23, 0.0  ;;  %v6756_v32 = vadd.f32 %v4063_v62, %v4062_v29  ;;  %v6758_v35 = vadd.f32 %v4077_v11, %v4076_v44  ;;  %v4102_v37 = vadd.f32 %v4101_v31, %v4100_v20 }
 0x328   : > { %v3896_v1 = vadd.f32 %v5658_v21, %v6698_v14  ;;  %v5661_v3 = vpop.f32.mrb[60].mxu1  ;;  %v6761_v57 = vadd.f32 %v4089_v26, %v4088_v60  ;;  %v4093_v6 = vsel %vm2909_vm2, %v3965_v36, 0.0  ;;  %v3967_v10 = vmax.f32 %v3881_v17, 0.0 }
 0x329   : > { %v4114_v9 = vsel %vm2909_vm2, %v3968_v34, 0.0  ;;  %v3900_v18 = vpop.f32.mrb[61].mxu1  ;;  %v4083_v22 = vadd.f32 %v4082_v33, %v4081_v16  ;;  %v4103_v25 = vrot.slane %v4102_v37, 2  ;;  %v4094_v30 = vrot.slane %v4093_v6, 4 }
 0x32a   : > { %v4115_v38 = vrot.slane %v4114_v9, 4  ;;  %v6765_v29 = vadd.f32 %v4070_v49, %v4069_v12  ;;  %v4107_v42 = vsel %vm2909_vm2, %v3967_v10, 0.0  ;;  %v3970_v45 = vmax.f32 %v3896_v1, 0.0 }
 0x32b   : > { %v3891_v46 = vadd.f32 %v3890_v41, %v6698_v14  ;;  %v4104_v50 = vadd.f32 %v4103_v25, %v4102_v37  ;;  %v4095_v54 = vadd.f32 %v4094_v30, %v4093_v6  ;;  %v4108_v63 = vrot.slane %v4107_v42, 4 }
 0x32c   : > { %v4116_v58 = vadd.f32 %v4115_v38, %v4114_v9  ;;  %v5664_v39 = vpop.f32.mrb[62].mxu1  ;;  %v4091_v40 = vrot.slane %v6761_v57, 1  ;;  %v4128_v44 = vsel %vm2909_vm2, %v3970_v45, 0.0  ;;  %v3906_v47 = vadd.f32 %v5661_v3, %v6698_v14 }
 0x32d   : > { %v3969_v27 = vmax.f32 %v3891_v46, 0.0  ;;  %v3910_v51 = vpop.f32.mrb[63].mxu1  ;;  %v4084_v52 = vrot.slane %v4083_v22, 1  ;;  %v4096_v55 = vrot.slane %v4095_v54, 2  ;;  %v4109_v60 = vadd.f32 %v4108_v63, %v4107_v42 }
 0x32e   : > { %v4117_v56 = vrot.slane %v4116_v58, 2  ;;  %v4129_v61 = vrot.slane %v4128_v44, 4  ;;  %v3972_v2 = vmax.f32 %v3906_v47, 0.0  ;;  %v3901_v4 = vadd.f32 %v3900_v18, %v6698_v14 }
 0x32f   : > { %v4121_v62 = vsel %vm2909_vm2, %v3969_v27, 0.0  ;;  %v4105_v8 = vrot.slane %v4104_v50, 1  ;;  %v4097_v11 = vadd.f32 %v4096_v55, %v4095_v54  ;;  %v4110_v15 = vrot.slane %v4109_v60, 2 }
 0x330   : > { %v4118_v12 = vadd.f32 %v4117_v56, %v4116_v58  ;;  %v4130_v21 = vadd.f32 %v4129_v61, %v4128_v44  ;;  %v4122_v26 = vrot.slane %v4121_v62, 4  ;;  %v4142_v16 = vsel %vm2909_vm2, %v3972_v2, 0.0 }
 0x331   : > { %v3971_v20 = vmax.f32 %v3901_v4, 0.0  ;;  %v6775_v23 = vadd.f32 %v4084_v52, %v4083_v22  ;;  %v4098_v41 = vrot.slane %v4097_v11, 1  ;;  %v4111_v49 = vadd.f32 %v4110_v15, %v4109_v60 }
 0x332   : > { %v4143_v31 = vrot.slane %v4142_v16, 4  ;;  %v5667_v33 = vpop.f32.mrb[64].mxu1  ;;  %v4131_v36 = vrot.slane %v4130_v21, 2  ;;  %v4123_v34 = vadd.f32 %v4122_v26, %v4121_v62  ;;  %v3916_v37 = vadd.f32 %v5664_v39, %v6698_v14 }
 0x333   : > { %v4135_v17 = vsel %vm2909_vm2, %v3971_v20, 0.0  ;;  %v3920_v1 = vpop.f32.mrb[65].mxu1  ;;  %v6779_v3 = vadd.f32 %v4105_v8, %v4104_v50  ;;  %v6781_v6 = vadd.f32 %v4098_v41, %v4097_v11  ;;  %v4119_v9 = vrot.slane %v4118_v12, 1 }
 0x334   : > { %v4144_v10 = vadd.f32 %v4143_v31, %v4142_v16  ;;  %v4132_v18 = vadd.f32 %v4131_v36, %v4130_v21  ;;  %v4124_v22 = vrot.slane %v4123_v34, 2  ;;  %v4136_v25 = vrot.slane %v4135_v17, 4 }
 0x335   : > { %v3974_v30 = vmax.f32 %v3916_v37, 0.0  ;;  %v4112_v38 = vrot.slane %v4111_v49, 1  ;;  %v3911_v45 = vadd.f32 %v3910_v51, %v6698_v14  ;;  %v3926_v46 = vadd.f32 %v5667_v33, %v6698_v14 }
 0x336   : > { %v4145_v42 = vrot.slane %v4144_v10, 2  ;;  %v5670_v54 = vpop.f32.mrb[66].mxu1  ;;  %v4133_v58 = vrot.slane %v4132_v18, 1  ;;  %v4125_v63 = vadd.f32 %v4124_v22, %v4123_v34  ;;  %v4137_v39 = vadd.f32 %v4136_v25, %v4135_v17 }
 0x337   : > { %v4156_v50 = vsel %vm2909_vm2, %v3974_v30, 0.0  ;;  %v3930_v44 = vpop.f32.mrb[67].mxu1  ;;  %v3973_v52 = vmax.f32 %v3911_v45, 0.0  ;;  %v3976_v55 = vmax.f32 %v3926_v46, 0.0  ;;  %v6786_v56 = vadd.f32 %v4119_v9, %v4118_v12 }
 0x338   : > { %v4146_v27 = vadd.f32 %v4145_v42, %v4144_v10  ;;  %v4157_v47 = vrot.slane %v4156_v50, 4  ;;  %v4126_v60 = vrot.slane %v4125_v63, 1  ;;  %v4138_v61 = vrot.slane %v4137_v39, 2 }
 0x339   : > { %v3921_v62 = vadd.f32 %v3920_v1, %v6698_v14  ;;  %v6789_v51 = vadd.f32 %v4112_v38, %v4111_v49  ;;  %v4149_v4 = vsel %vm2909_vm2, %v3973_v52, 0.0  ;;  %v4170_v8 = vsel %vm2909_vm2, %v3976_v55, 0.0 }
 0x33a   : > { %v4158_v2 = vadd.f32 %v4157_v47, %v4156_v50  ;;  %v5673_v11 = vpop.f32.mrb[68].mxu1  ;;  %v6793_v15 = vadd.f32 %v4133_v58, %v4132_v18  ;;  %v4139_v21 = vadd.f32 %v4138_v61, %v4137_v39  ;;  %v4150_v26 = vrot.slane %v4149_v4, 4 }
 0x33b   : > { %v4171_v16 = vrot.slane %v4170_v8, 4  ;;  %v3940_v20 = vpop.f32.mrb[69].mxu1  ;;  %v4147_v12 = vrot.slane %v4146_v27, 1  ;;  %v3975_v31 = vmax.f32 %v3921_v62, 0.0  ;;  %v3936_v33 = vadd.f32 %v5670_v54, %v6698_v14 }
 0x33c   : > { %v4159_v41 = vrot.slane %v4158_v2, 2  ;;  %v6796_v36 = vadd.f32 %v4126_v60, %v4125_v63  ;;  %v4151_v49 = vadd.f32 %v4150_v26, %v4149_v4  ;;  %v3931_v17 = vadd.f32 %v3930_v44, %v6698_v14 }
 0x33d   : > { %v4172_v34 = vadd.f32 %v4171_v16, %v4170_v8  ;;  %v4163_v1 = vsel %vm2909_vm2, %v3975_v31, 0.0  ;;  %v3978_v9 = vmax.f32 %v3936_v33, 0.0  ;;  %v3946_v10 = vadd.f32 %v5673_v11, %v6698_v14 }
 0x33e   : > { %v4160_v37 = vadd.f32 %v4159_v41, %v4158_v2  ;;  %v4275_v18 = vpop.f32.mrb[70].mxu1  ;;  %v4140_v22 = vrot.slane %v4139_v21, 1  ;;  %v4152_v25 = vrot.slane %v4151_v49, 2  ;;  %v4164_v38 = vrot.slane %v4163_v1, 4 }
 0x33f   : > { %v4173_v30 = vrot.slane %v4172_v34, 2  ;;  %v5684_v42 = vpop.f32.mrb[71].mxu1  ;;  %v4184_v46 = vsel %vm2909_vm2, %v3978_v9, 0.0  ;;  %v3977_v54 = vmax.f32 %v3931_v17, 0.0  ;;  %v3980_v58 = vmax.f32 %v3946_v10, 0.0 }
 0x340   : > { %v4161_v45 = vrot.slane %v4160_v37, 1  ;;  %v4153_v63 = vadd.f32 %v4152_v25, %v4151_v49  ;;  %v4165_v50 = vadd.f32 %v4164_v38, %v4163_v1  ;;  %v4185_v44 = vrot.slane %v4184_v46, 4 }
 0x341   : > { %v4174_v39 = vadd.f32 %v4173_v30, %v4172_v34  ;;  %v6802_v47 = vadd.f32 %v4147_v12, %v4146_v27  ;;  %v4177_v52 = vsel %vm2909_vm2, %v3977_v54, 0.0  ;;  %v4198_v55 = vsel %vm2909_vm2, %v3980_v58, 0.0 }
 0x342   : > { %v3941_v60 = vadd.f32 %v3940_v20, %v6698_v14  ;;  %v4141_v61 = vadd.f32 %v4140_v22, %v4139_v21  ;;  %v4154_v62 = vrot.slane %v4153_v63, 1  ;;  %v4166_v2 = vrot.slane %v4165_v50, 2 }
 0x343   : > { %v4186_v4 = vadd.f32 %v4185_v44, %v4184_v46  ;;  %v4178_v8 = vrot.slane %v4177_v52, 4  ;;  %v4199_v11 = vrot.slane %v4198_v55, 4  ;;  %v4276_v16 = vadd.f32 %v6694_v0, %v4275_v18 }
 0x344   : > { %v3979_v26 = vmax.f32 %v3941_v60, 0.0  ;;  %v6808_v41 = vadd.f32 %v4161_v45, %v4160_v37  ;;  %v4175_v31 = vrot.slane %v4174_v39, 1  ;;  %v4167_v27 = vadd.f32 %v4166_v2, %v4165_v50 }
 0x345   : > { %v4187_v12 = vrot.slane %v4186_v4, 2  ;;  %v4179_v33 = vadd.f32 %v4178_v8, %v4177_v52  ;;  %v4200_v49 = vadd.f32 %v4199_v11, %v4198_v55  ;;  %v4279_v17 = vmax.f32 %v4276_v16, 0.0 }
 0x346   : > { %v4191_v34 = vsel %vm2909_vm2, %v3979_v26, 0.0  ;;  %v6811_v14 = vadd.f32 %v4154_v62, %v4153_v63  ;;  %v4168_v21 = vrot.slane %v4167_v27, 1  ;;  %v4449_v0 = vsel %vm4324_vm5, %v6724_v43, %v6721_v7 }
 0x347   : > { %v4188_v20 = vadd.f32 %v4187_v12, %v4186_v4  ;;  %v4192_v1 = vrot.slane %v4191_v34, 4  ;;  %v4180_v9 = vrot.slane %v4179_v33, 2  ;;  %v4201_v10 = vrot.slane %v4200_v49, 2 }
 0x348   : > { %v4280_v22 = vmul.f32 2.0, %v4279_v17  ;;  %v4176_v37 = vadd.f32 %v4175_v31, %v4174_v39  ;;  %v4450_v30 = vsel %vm4327_vm6, %v6735_v19, %v4449_v0  ;;  %v4169_v54 = vadd.f32 %v4168_v21, %v4167_v27 }
 0x349   : > { %v4189_v18 = vrot.slane %v4188_v20, 1  ;;  %v4193_v25 = vadd.f32 %v4192_v1, %v4191_v34  ;;  %v4181_v38 = vadd.f32 %v4180_v9, %v4179_v33  ;;  %v4202_v42 = vadd.f32 %v4201_v10, %v4200_v49 }
 0x34a   : > { %v6819_v45 = vrot.slane %v4280_v22, %v6590_v13  ;;  %v4451_v46 = vsel %vm4330_vm7, %v6726_v48, %v4450_v30  ;;  %v4456_v7 = vsel %vm4324_vm5, %v6756_v32, %v6753_v28  ;;  %v4036_v1 = vadd.f32 %v4035_v53, %v6729_v59 }
 0x34b   : > { %v4194_v58 = vrot.slane %v4193_v25, 2  ;;  %v4452_v63 = vsel %vm4333_vm8, %v6750_v24, %v4451_v46  ;;  %v4182_v43 = vrot.slane %v4181_v38, 1  ;;  %v4203_v19 = vrot.slane %v4202_v42, 1 }
 0x34c   : > { %v4285_v39 = vsub.f32 %v6781_v6, %v6819_v45  ;;  %v4286_v13 = vsub.f32 %v6779_v3, %v6819_v45  ;;  %v4287_v50 = vsub.f32 %v6789_v51, %v6819_v45  ;;  %v4288_v24 = vsub.f32 %v6786_v56, %v6819_v45 }
 0x34d   : > { %v4195_v48 = vadd.f32 %v4194_v58, %v4193_v25  ;;  %v4289_v44 = vsub.f32 %v6796_v36, %v6819_v45  ;;  %v4190_v28 = vadd.f32 %v4189_v18, %v4188_v20  ;;  %v4183_v32 = vadd.f32 %v4182_v43, %v4181_v38 }
 0x34e   : > { %v4290_v52 = vsub.f32 %v6793_v15, %v6819_v45  ;;  %v4291_v6 = vsub.f32 %v4141_v61, %v6819_v45  ;;  %v4292_v3 = vsub.f32 %v6802_v47, %v6819_v45  ;;  %v4317_v51 = vrot.slane %v4286_v13, 7  ;;  %v559_v13 = vld [vmem:[#allocation2 + $0xb8] sm:$0xff] }
 0x34f   : > { %v4196_v55 = vrot.slane %v4195_v48, 1  ;;  %v4320_v60 = vrot.slane %v4287_v50, 6  ;;  %v4204_v56 = vadd.f32 %v4203_v19, %v4202_v42  ;;  %v4323_v62 = vrot.slane %v4288_v24, 5  ;;  %v556_v19 = vld [vmem:[#allocation2 + $0xa0] sm:$0xff] }
 0x350   : > { %v4326_v2 = vrot.slane %v4289_v44, 4  ;;  %v4329_v36 = vrot.slane %v4290_v52, 3  ;;  %v4319_v8 = vsel %vm4318_vm3, %v4317_v51, %v4285_v39  ;;  %v4332_v11 = vrot.slane %v4291_v6, 2  ;;  %v557_v39 = vld [vmem:[#allocation2 + $0xa8] sm:$0xff]  ;;  %v567_v50 = vld [vmem:[%s7057_s6] sm:$0xff]  ;;  %v569_v51 = vld [vmem:[%s7057_s6 + $0x10] sm:$0xff] }
 0x351   : > { %v4197_v4 = vadd.f32 %v4196_v55, %v4195_v48  ;;  %v4293_v15 = vsub.f32 %v6811_v14, %v6819_v45  ;;  %v4322_v61 = vsel %vm4321_vm4, %v4320_v60, %v4319_v8  ;;  %v4294_v26 = vsub.f32 %v6808_v41, %v6819_v45  ;;  %v5128_v44 = vld [vmem:[%s7056_s5 + $0x2] ss:$0 sm:$0xff]  ;;  %v570_v60 = vld [vmem:[%s7057_s6 + $0x18] sm:$0xff] }
 0x352   : > { %v4295_v47 = vsub.f32 %v4169_v54, %v6819_v45  ;;  %v4296_v16 = vsub.f32 %v4176_v37, %v6819_v45  ;;  %v4325_v31 = vsel %vm4324_vm5, %v4323_v62, %v4322_v61  ;;  %v4297_v27 = vsub.f32 %v4183_v32, %v6819_v45  ;;  %v5129_v62 = vld [vmem:[%s7056_s5 + $0x3] ss:$0 sm:$0xff]  ;;  %v5132_v61 = vld [vmem:[%s7058_s7] ss:$0 sm:$0xff] }
 0x353   : > { %v4298_v12 = vsub.f32 %v4190_v28, %v6819_v45  ;;  %v4299_v33 = vsub.f32 %v4197_v4, %v6819_v45  ;;  %v4328_v49 = vsel %vm4327_vm6, %v4326_v2, %v4325_v31  ;;  %v4300_v34 = vsub.f32 %v4204_v56, %v6819_v45 }
 0x354   : > { %v4338_v17 = vrot.slane %v4294_v26, 7  ;;  %v4340_v14 = vrot.slane %v4295_v47, 6  ;;  %v4331_v41 = vsel %vm4330_vm7, %v4329_v36, %v4328_v49  ;;  %v4335_v21 = vrot.slane %v4292_v3, 1 }
 0x355   : > { %v4344_v20 = vrot.slane %v4297_v27, 4  ;;  %v4334_v9 = vsel %vm4333_vm8, %v4332_v11, %v4331_v41  ;;  %v4342_v22 = vrot.slane %v4296_v16, 5  ;;  %v4348_v0 = vrot.slane %v4299_v33, 2 }
 0x356   : > { %v4339_v10 = vsel %vm4318_vm3, %v4338_v17, %v4293_v15  ;;  %v4337_v37 = vsel %vm4336_vm9, %v4335_v21, %v4334_v9  ;;  %v4453_v25 = vsel %vm4336_vm9, %v4036_v1, %v4452_v63  ;;  %v4457_v30 = vsel %vm4327_vm6, %v6765_v29, %v4456_v7  ;;  %v549_v29 = vld [vmem:[#allocation2 + $0x78] sm:$0xff] }
 0x357   : > { %v4341_v18 = vsel %vm4321_vm4, %v4340_v14, %v4339_v10  ;;  %v4092_v38 = vadd.f32 %v4091_v40, %v6761_v57  ;;  %5693 = vmatprep.mubr.msk.f32.mxu1 %vm2909_vm2, %v4337_v37  ;;  %4761 = vst.msk [vmem:[%s6878_s12] sm:$0xff] %vm2909_vm2, %v4337_v37  ;;  %v4346_v53 = vrot.slane %v4298_v12, 3  ;;  %4757 = vst.msk [vmem:[%s6885_s18] sm:$0xff] %vm2909_vm2, %v4453_v25  ;;  %v548_v57 = vld [vmem:[#allocation2 + $0x70] sm:$0xff]  ;;  %v4350_v54 = vrot.slane %v4300_v34, 1 }
 0x358   : > { %v4343_v59 = vsel %vm4324_vm5, %v4342_v22, %v4341_v18  ;;  %v4458_v40 = vsel %vm4330_vm7, %v6758_v35, %v4457_v30  ;;  %v5771_v7 = vpack.c.bf16 %v549_v29, %v548_v57  ;;  %v5775_v35 = vpack.c.bf16 %v557_v39, %v556_v19 }
 0x359   : > { %v4345_v42 = vsel %vm4327_vm6, %v4344_v20, %v4343_v59  ;;  %v4459_v45 = vsel %vm4333_vm8, %v6775_v23, %v4458_v40  ;;  %v558_v23 = vld [vmem:[#allocation2 + $0xb0] sm:$0xff]  ;;  %v5787_v56 = vpack.c.bf16 %v570_v60, %v569_v51 }
 0x35a   : > { %v4347_v46 = vsel %vm4330_vm7, %v4346_v53, %v4345_v42  ;;  %v4460_v58 = vsel %vm4336_vm9, %v4092_v38, %v4459_v45  ;;  %v5779_v48 = vpack.c.bf16 %v559_v13, %v558_v23 }
 0x35b   : > { %v4349_v63 = vsel %vm4333_vm8, %v4348_v0, %v4347_v46  ;;  %4758 = vst.msk [vmem:[%s6885_s18 + $0x8] sm:$0xff] %vm2909_vm2, %v4460_v58 }
 0x35c   : > { %v4351_v43 = vsel %vm4336_vm9, %v4350_v54, %v4349_v63 }
 0x35d   : > { %5694 = vmatmul.mubr.msk.f32.vlgmr.msra.gmra.mrb[72].mxu1 %vm2909_vm2, %v4351_v43  ;;  %4762 = vst.msk [vmem:[%s6878_s12 + $0x8] sm:$0xff] %vm2909_vm2, %v4351_v43  ;;  %s6033_s12 = smov [#allocation5]  }
 0x35e   : > { %5770 = vmatpush3.bf16.msra.mxu1 %v6688_v5  ;;  %5704 = vmatprep.mubr.msk.f32.mxu1 %vm2909_vm2, %v4453_v25  ;;  %v568_v5 = vld [vmem:[%s7057_s6 + $0x8] sm:$0xff]  ;;  %s5931_s18 = sshll.u32 %s6033_s12, 4  ;;  %s5932_s18 = int_to_ptr.vmem [resolvable:$false] %s5931_s18 }
 0x35f   : > { %5772 = vmatprep.subr.bf16.mxu1 %v5771_v7  ;;  %v5783_v24 = vpack.c.bf16 %v568_v5, %v567_v50  ;;  %s5933_s0 = scalar_lea.vmem %s5932_s18, 512  ;;  %p5934_p2 = scmp.lt.s32.totalorder %s6953_s30, %s5932_s18 }
 0x360   : > { %p5935_p3 = scmp.lt.s32.totalorder %s5933_s0, %s5927_s21 }
 0x362   : > { %5774 = vmatpush3.bf16.msra.mxu1 %v5771_v7  ;;  %p5936_p4 = por %p5935_p3, %p5934_p2 }
 0x363   : > { %5776 = vmatprep.subr.bf16.mxu1 %v5775_v35 }
 0x364   : > { %p5937_p7 = pnand %p5936_p4, %p5930_p12 }
 0x365   : > { %5705 = vmatmul.mubr.msk.f32.vlgmr.msra.gmra.mrb[72].mxu1 %vm2909_vm2, %v4460_v58 }
 0x366   : > { %5778 = vmatpush3.bf16.msra.mxu1 %v5775_v35 }
 0x367   : > { %5780 = vmatprep.subr.bf16.mxu1 %v5779_v48 }
 0x36a   : > { %5782 = vmatpush3.bf16.msra.mxu1 %v5779_v48 }
 0x36b   : > { %5784 = vmatprep.subr.bf16.mxu1 %v5783_v24 }
 0x438   : > { %v5706_v28 = vpop.f32.mrb[72].mxu1 }
 0x439   : > { %v4547_v32 = vadd.f32 %v5706_v28, %v5128_v44  ;;  %v4531_v52 = vpop.f32.mrb[73].mxu1 }
 0x43a   : > { %v4546_v6 = vadd.f32 %v5128_v44, %v4531_v52 }
 0x43b   : > { %v4549_v3 = vmax.f32 %v4547_v32, 0.0 }
 0x43c   : > { %v4548_v55 = vmax.f32 %v4546_v6, 0.0 }
 0x43e   : > { %5715 = vmatprep.mubr.msk.f32.mxu1 %vm2909_vm2, %v4548_v55 }
 0x43f   : > { %5716 = vmatmul.mubr.msk.f32.vlgmr.msra.gmra.mrb[74].mxu1 %vm2909_vm2, %v4549_v3 }
 0x440   : > { %5786 = vmatpush3.bf16.msra.mxu1 %v5783_v24 }
 0x441   : > { %5788 = vmatprep.subr.bf16.mxu1 %v5787_v56 }
 0x444   : > { %5790 = vmatpush3.bf16.msra.mxu1 %v5787_v56 }
 0x512   : > { %v5717_v2 = vpop.f32.mrb[74].mxu1 }
 0x513   : > { %v4634_v36 = vadd.f32 %v5717_v2, %v5129_v62  ;;  %v4628_v4 = vpop.f32.mrb[75].mxu1 }
 0x514   : > { %v4629_v8 = vadd.f32 %v5129_v62, %v4628_v4 }
 0x515   : > { %v4638_v15 = vmax.f32 %v4634_v36, 0.0 }
 0x516   : > { %v4637_v11 = vmax.f32 %v4629_v8, 0.0 }
 0x518   : > { %5726 = vmatprep.mubr.msk.f32.mxu1 %vm2909_vm2, %v4637_v11 }
 0x519   : > { %5727 = vmatmul.mubr.msk.f32.vlgmr.msra.gmra.mrb[76].mxu1 %vm2909_vm2, %v4638_v15 }
 0x5ec   : > { %v5728_v26 = vpop.f32.mrb[76].mxu1 }
 0x5ed   : > { %v4717_v47 = vpop.f32.mrb[77].mxu1  ;;  %v6933_v31 = vadd.f32 %v5728_v26, %v5132_v61 }
 0x5ee   : > { %v6931_v16 = vadd.f32 %v5132_v61, %v4717_v47 }
 0x5ef   : > { %v4730_v12 = vsel %vm4726_vm10, %v6933_v31, -inf }
 0x5f0   : > { %v4727_v27 = vsel %vm4726_vm10, %v6931_v16, -inf }
 0x5f1   : > { %4728 = vmax.xlane.f32.xlu0 %v4727_v27 }
 0x5f5   : > { %4731 = vmax.xlane.f32.xlu0 %v4730_v12 }
 0x67e   : > { %v6939_v33 = vpop.xlane.xlu0 %4728 }
 0x67f   : > { %v4733_v49 = vsub.f32 %v6931_v16, %v6939_v33 }
 0x681   : > { %v4735_v34 = vmul.f32 1.442695, %v4733_v49 }
 0x682   : > { %v6943_v17 = vpop.xlane.xlu0 %4731 }
 0x683   : > { %5891 = vpow2.f32 %v4735_v34  ;;  %v4734_v14 = vsub.f32 %v6933_v31, %v6943_v17 }
 0x685   : > { %v4737_v41 = vmul.f32 1.442695, %v4734_v14 }
 0x687   : > { %5893 = vpow2.f32 %v4737_v41 }
 0x68d   : > { %v5892_v21 = vpop.eup %5891 }
 0x68e   : > { %v4739_v20 = vsel %vm4726_vm10, %v5892_v21, 0.0 }
 0x68f   : > { %4740 = vadd.xlane.f32.xlu1 %v4739_v20 }
 0x691   : > { %v5894_v1 = vpop.eup %5893 }
 0x692   : > { %v4742_v9 = vsel %vm4726_vm10, %v5894_v1, 0.0 }
 0x693   : > { %4743 = vadd.xlane.f32.xlu1 %v4742_v9 }
 0x694   : > { %5940 = shalt.err (!%p5937_p7)
}
 0x695   : > { %s5941_s27 = scalar_lea.hbm %s6961_s25, 256  ;;  %s5945_s12 = scalar_lea.hbm %s7060_s9, 512 }
 0x696   : > { %p5942_p8 = scmp.ne.s32.totalorder %s6961_s25, %s5941_s27  ;;  %p5946_p1 = scmp.lt.u32.totalorder %s6961_s25, %s7060_s9 }
 0x697   : > { %p5947_p0 = scmp.lt.u32.totalorder %s5945_s12, %s5941_s27  ;;  %p5949_p6 = scmp.lt.u32.totalorder %s5941_s27, %s6961_s25 }
 0x698   : > { %p5943_p11 = pnand %p5942_p8, %p7083_p9 }
 0x699   : > { %p5948_p5 = por %p5947_p0, %p5946_p1 }
 0x69a   : > { %p5944_p13 = pneg %p5943_p11 }
 0x69b   : > { %p5950_p10 = por %p5949_p6, %p5948_p5 }
 0x69d   : > { %p5951_p12 = pnand %p5950_p10, %p5944_p13 }
 0x69f   : > { %5954 = shalt.err (!%p5951_p12)
}
 0x6a0   : > { %s6034_s0 = smov 128   ;;  %s6035_s11 = smov 8  }
 0x6a1   : > { %s7084_s20 = scalar_lea.sflag [#allocation4], %s6842_s29  ;;  %s7085_s21 = sshll.u32 %s6113_s17, 8 }
 0x6a2   : > { %5833 = dma.vmem_to_hbm [thread:$0]  (%p7083_p9), %s6953_s30, 256, %s6961_s25, %s7084_s20, %s6034_s0, %s6034_s0, %s6035_s11  }
 0x6a3   : > { %s6995_s12 = scalar_lea.hbm %s7061_s10, %s7085_s21  ;;  %s4774_s18 = scalar_lea.sflag [#allocation7], %s6842_s29 }
 0x6a4   : > { %s5955_s1 = scalar_lea.vmem %s6951_s26, 256  ;;  %s6036_s2 = smov [#allocation6]  }
 0x6a5   : > { %p5956_p2 = scmp.ne.s32.totalorder %s6951_s26, %s5955_s1  ;;  %s5959_s3 = sshll.u32 %s6036_s2, 4  ;;  %s5960_s3 = int_to_ptr.vmem [resolvable:$false] %s5959_s3 }
 0x6a6   : > { %s5961_s4 = scalar_lea.vmem %s5960_s3, 512  ;;  %p5962_p7 = scmp.lt.s32.totalorder %s6951_s26, %s5960_s3 }
 0x6a7   : > { %p5957_p3 = pnand %p5956_p2, %p7083_p9  ;;  %p5963_p8 = scmp.lt.s32.totalorder %s5961_s4, %s5955_s1 }
 0x6a9   : > { %p5958_p4 = pneg %p5957_p3  ;;  %p5964_p11 = por %p5963_p8, %p5962_p7 }
 0x6ab   : > { %p5965_p13 = pnand %p5964_p11, %p5958_p4 }
 0x6ad   : > { %5968 = shalt.err (!%p5965_p13)
}
 0x6ae   : > { %s5969_s30 = scalar_lea.hbm %s6995_s12, 256  ;;  %s5973_s2 = scalar_lea.hbm %s7061_s10, 512 }
 0x6af   : > { %p5970_p1 = scmp.ne.s32.totalorder %s6995_s12, %s5969_s30  ;;  %p5974_p6 = scmp.lt.u32.totalorder %s6995_s12, %s7061_s10 }
 0x6b0   : > { %p5975_p10 = scmp.lt.u32.totalorder %s5973_s2, %s5969_s30  ;;  %p5977_p2 = scmp.lt.u32.totalorder %s5969_s30, %s6995_s12 }
 0x6b1   : > { %p5971_p0 = pnand %p5970_p1, %p7083_p9 }
 0x6b2   : > { %p5976_p12 = por %p5975_p10, %p5974_p6 }
 0x6b3   : > { %p5972_p5 = pneg %p5971_p0 }
 0x6b4   : > { %p5978_p3 = por %p5977_p2, %p5976_p12 }
 0x6b6   : > { %p5979_p4 = pnand %p5978_p3, %p5972_p5 }
 0x6b8   : > { %5982 = shalt.err (!%p5979_p4)
}
 0x6b9   : > { %5834 = dma.vmem_to_hbm [thread:$0]  (%p7083_p9), %s6951_s26, 256, %s6995_s12, %s4774_s18, %s6034_s0, %s6034_s0, %s6035_s11  }
 0x6ba   : > { %s4990_s1 = sshll.u32 %s6113_s17, 1 }
 0x6bb   : > { %p460_p7 = scmp.lt.s32.totalorder %s4990_s1, 3 }
 0x6bd   : > { %s7094_s1 = smov (!%p460_p7, %s4990_s1), 3 }
 0x6be   : > { %s4991_s4 = sshll.u32 %s7094_s1, 3 }
 0x6bf   : > { %s463_s29 = scalar_lea.vmem %s7059_s8, %s4991_s4 }
 0x71c   : > { %v4741_v10 = vpop.xlane.xlu1 %4740 }
 0x71d   : > { %5895 = vlog2.f32 %v4741_v10 }
 0x720   : > { %v4744_v22 = vpop.xlane.xlu1 %4743 }
 0x721   : > { %5897 = vlog2.f32 %v4744_v22 }
 0x727   : > { %v5896_v0 = vpop.eup %5895 }
 0x728   : > { %v4746_v37 = vmul.f32 0.6931472, %v5896_v0 }
 0x72a   : > { %v4749_v18 = vadd.f32 %v4746_v37, %v6939_v33 }
 0x72b   : > { %v5898_v25 = vpop.eup %5897 }
 0x72c   : > { %v4751_v30 = vsub.f32 %v6931_v16, %v4749_v18  ;;  %v4748_v38 = vmul.f32 0.6931472, %v5898_v25 }
 0x72e   : > { %4753 = vst.msk [vmem:[%s463_s29] sm:$0xff] %vm4726_vm10, %v4751_v30  ;;  %v4750_v59 = vadd.f32 %v4748_v38, %v6943_v17 }
 0x730   : > { %v4752_v53 = vsub.f32 %v6933_v31, %v4750_v59 }
 0x732   : > { %4754 = vst.msk [vmem:[%s463_s29 + $0x8] sm:$0xff] %vm4726_vm10, %v4752_v53 }
 0x733 PF: > { %p5850_p9 = scmp.ge.s32.totalorder %s6025_s16, 2  ;;  %s4830_s17 = sand.u32 1, %s6013_s13  }
 0x734   : > { %p7086_p8 = scmp.ne.s32.totalorder %s7072_s24, 0  ;;  %s4831_s26 = scalar_lea.sflag [#allocation4], %s4830_s17 }
 0x736   : > { %p5842_p11 = pnand %p5850_p9, %p7086_p8 }
 0x738   : > { %6004 = dma.done.wait (!%p5842_p11), %s4831_s26, 256  }
 0x739   : > { %6006 = vsyncadd (!%p5842_p11), %s4831_s26, 4294967040  ;;  %s4840_s0 = scalar_lea.sflag [#allocation7], %s4830_s17 }
 0x73a   : > { %6008 = dma.done.wait (!%p5842_p11), %s4840_s0, 256  }
 0x73b   : > { %6010 = vsyncadd (!%p5842_p11), %s4840_s0, 4294967040  ;;  %p25_p13 = scmp.ge.s32.totalorder %s6117_s19, 4   ;;  %s7087_s13 = smov %s6017_s14 }
 0x73c   : > { %s7088_s14 = smov %s6021_s15  ;;  %s7089_s15 = smov %s6128_s22 }
 0x73d   : > { %s7090_s16 = smov %s6117_s19  ;;  %27 = sbr.rel (!%p25_p13) target bundleno = 12 (0xc), region = 138 }
 0x744   :  { %4845 = vsyncpa [#allocation3], 1 }
 0x745   :  { %4847 = vsyncpa [#allocation3 + $0x1], 1 }
 0x746   :  { %4848 = vsyncpa [#allocation4], 1 }
 0x747   :  { %4850 = vsyncpa [#allocation4 + $0x1], 1 }
 0x748   :  { %4851 = vsyncpa [#allocation7], 1 }
 0x749   :  { %4853 = vsyncpa [#allocation7 + $0x1], 1 }

</bundles_post_ra>
